<compile_context>
chip_gen: v5e
topology: v5e:2x2
jax: 0.10.0
libtpu: 0.0.40
codegen_flags: <defaults>
</compile_context>

<pallas_src>
import functools

import jax
import jax.numpy as jnp
import numpy as np
from jax.experimental import pallas as pl
from jax.experimental.pallas import tpu as pltpu

PER_LAYER = 3  # wih (in, 4H) bf16, whh (H, 4H) bf16, bias (1, 4H) f32


def _make_lstm_kernel(nlayers: int, seq_len: int, hidden: int):
    """Build the Pallas kernel body (single grid point, everything in VMEM)."""
    T, H = seq_len, hidden

    def kernel(x_ref, *args):
        param_refs = args[:-1]
        out_ref = args[-1]

        layer_refs = [param_refs[PER_LAYER * l: PER_LAYER * (l + 1)]
                      for l in range(nlayers)]
        wfc_ref, bfc_ref, wout_ref, bout_ref = param_refs[PER_LAYER * nlayers:]

        B = x_ref.shape[0]
        in0 = x_ref.shape[2]
        # (B, T, I) -> (B*T, I) bf16: flat view for the hoisted input projection.
        x_flat = x_ref[...].reshape(B * T, in0).astype(jnp.bfloat16)

        h = jnp.zeros((B, H), jnp.float32)
        h_below = None  # bf16 hidden sequence of the layer below (for l > 0)

        for l in range(nlayers):
            wih_ref, whh_ref, b_ref = layer_refs[l]
            wih = wih_ref[...]           # (in, 4H) bf16, fused i|f|g|o
            whh = whh_ref[...]           # (H, 4H)  bf16, fused i|f|g|o
            b = b_ref[...]               # (1, 4H)  f32, pre-summed bih + bhh

            if l == 0:
                # Hoisted batched input projection: one MXU matmul over B*T
                # rows, completely off the serial dependency chain.
                z_all = jnp.dot(x_flat, wih,
                                preferred_element_type=jnp.float32) + b
                z_all = z_all.reshape(B, T, 4 * H)
                zin = [z_all[:, t, :] for t in range(T)]      # (B, 4H) per step
            else:
                # Per-step input projection from the lower layer's h_t.  Each
                # zin[t] only depends on h_below[t] (ready one wavefront step
                # earlier), so it never blocks this layer's recurrence.
                zin = [jnp.dot(h_below[t], wih,
                               preferred_element_type=jnp.float32) + b
                       for t in range(T)]

            h = jnp.zeros((B, H), jnp.float32)
            c = jnp.zeros((B, H), jnp.float32)
            h_bf = h.astype(jnp.bfloat16)
            need_seq = (l + 1 < nlayers)
            hs = []

            # Serial recurrence, fully unrolled.  Only ONE fused (B,H)@(H,4H)
            # matmul + gate math per step sits on the dependency chain.
            for t in range(T):
                z = zin[t] + jnp.dot(h_bf, whh,
                                     preferred_element_type=jnp.float32)
                # Gate extraction: 32-lane slices of the fused 128-lane result
                # (XLU lane shifts; PyTorch gate order i, f, g, o).
                i_g = jax.nn.sigmoid(z[:, 0 * H:1 * H])
                f_g = jax.nn.sigmoid(z[:, 1 * H:2 * H])
                g_g = jnp.tanh(z[:, 2 * H:3 * H])
                o_g = jax.nn.sigmoid(z[:, 3 * H:4 * H])
                c = f_g * c + i_g * g_g
                h = o_g * jnp.tanh(c)
                h_bf = h.astype(jnp.bfloat16)
                if need_seq:
                    hs.append(h_bf)

            if need_seq:
                h_below = hs

        # Head: fc -> out on the last layer's final hidden state.
        fc = jnp.dot(h_bf, wfc_ref[...],
                     preferred_element_type=jnp.float32) + bfc_ref[...]
        out = jnp.dot(fc.astype(jnp.bfloat16), wout_ref[...],
                      preferred_element_type=jnp.float32) + bout_ref[...]
        out_ref[...] = out.astype(out_ref.dtype)

    return kernel


def init_params(key, input_size, hidden_size, lstm_hidden_size, output_size, nlayers):
    """PyTorch-layout parameters (uniform init like nn.LSTM / nn.Linear)."""
    H = lstm_hidden_size
    params = {"layers": []}
    for l in range(nlayers):
        in_dim = input_size if l == 0 else H
        bound = 1.0 / np.sqrt(H)
        key, k1, k2, k3, k4 = jax.random.split(key, 5)
        wih = jax.random.uniform(k1, (4 * H, in_dim), jnp.float32, -bound, bound)
        whh = jax.random.uniform(k2, (4 * H, H), jnp.float32, -bound, bound)
        bih = jax.random.uniform(k3, (4 * H,), jnp.float32, -bound, bound)
        bhh = jax.random.uniform(k4, (4 * H,), jnp.float32, -bound, bound)
        params["layers"].append((wih, whh, bih, bhh))

    bound = 1.0 / np.sqrt(H)
    key, k1, k2 = jax.random.split(key, 3)
    params["wfc"] = jax.random.uniform(k1, (hidden_size, H), jnp.float32, -bound, bound)
    params["bfc"] = jax.random.uniform(k2, (hidden_size,), jnp.float32, -bound, bound)

    bound = 1.0 / np.sqrt(hidden_size)
    key, k1, k2 = jax.random.split(key, 3)
    params["wout"] = jax.random.uniform(k1, (output_size, hidden_size), jnp.float32, -bound, bound)
    params["bout"] = jax.random.uniform(k2, (output_size,), jnp.float32, -bound, bound)
    return params


def pack_params(params, nlayers, lstm_hidden_size):
    """PyTorch-layout params -> kernel-ready layout:
       - matmul weights transposed to (in, out) and cast to bf16
         (Wih -> (in, 4H), Whh -> (H, 4H) fused i|f|g|o)
       - LSTM biases pre-summed into one (1, 4H) f32 row
       - fc / out weights transposed + bf16, biases f32 rows."""
    H = lstm_hidden_size
    flat = []
    for l in range(nlayers):
        wih, whh, bih, bhh = params["layers"][l]
        flat.append(jnp.asarray(wih).T.astype(jnp.bfloat16))          # (in, 4H)
        flat.append(jnp.asarray(whh).T.astype(jnp.bfloat16))          # (H, 4H)
        flat.append((bih + bhh).reshape(1, 4 * H).astype(jnp.float32))
    flat.append(jnp.asarray(params["wfc"]).T.astype(jnp.bfloat16))    # (H, hidden)
    flat.append(params["bfc"].reshape(1, -1).astype(jnp.float32))
    flat.append(jnp.asarray(params["wout"]).T.astype(jnp.bfloat16))   # (hidden, out)
    flat.append(params["bout"].reshape(1, -1).astype(jnp.float32))
    return tuple(flat)


@functools.partial(jax.jit, static_argnames=("nlayers", "lstm_hidden_size", "output_size"))
def lstm_net_forward(x, flat_params, *, nlayers, lstm_hidden_size, output_size):
    """x: (B, T, input_size) batch-first (PyTorch convention). No wrapper-side
    layout ops: x goes straight in, the (B, output_size) result comes straight out."""
    B, T, _ = x.shape
    kernel = _make_lstm_kernel(nlayers, T, lstm_hidden_size)
    vmem = pl.BlockSpec(memory_space=pltpu.MemorySpace.VMEM)
    n_inputs = 1 + len(flat_params)

    return pl.pallas_call(
        kernel,
        out_shape=jax.ShapeDtypeStruct((B, output_size), jnp.float32),
        in_specs=[vmem] * n_inputs,
        out_specs=vmem,
    )(x, *flat_params)


def lstm_net_reference(x, params, nlayers, H):
    """Pure-JAX f32 reference using the PyTorch-layout params."""
    B, T, _ = x.shape
    h = [jnp.zeros((B, H), jnp.float32) for _ in range(nlayers)]
    c = [jnp.zeros((B, H), jnp.float32) for _ in range(nlayers)]
    for t in range(T):
        inp = x[:, t, :]
        for l in range(nlayers):
            wih, whh, bih, bhh = params["layers"][l]
            z = inp @ wih.T + h[l] @ whh.T + bih + bhh
            i_g = jax.nn.sigmoid(z[:, :H])
            f_g = jax.nn.sigmoid(z[:, H:2 * H])
            g_g = jnp.tanh(z[:, 2 * H:3 * H])
            o_g = jax.nn.sigmoid(z[:, 3 * H:])
            c[l] = f_g * c[l] + i_g * g_g
            h[l] = o_g * jnp.tanh(c[l])
            inp = h[l]
    fc = h[-1] @ params["wfc"].T + params["bfc"]
    return fc @ params["wout"].T + params["bout"]


if __name__ == "__main__":
    B, T = 2, 8
    input_size = 16
    lstm_hidden_size = 32
    hidden_size = 32          # must equal lstm_hidden_size for the PyTorch module to run
    output_size = 8
    nlayers = 2
    assert hidden_size == lstm_hidden_size, (
        "LSTMNet only runs when hidden_size == lstm_hidden_size (h0/c0 shapes)")

    key = jax.random.PRNGKey(0)
    key, kx = jax.random.split(key)
    x = jax.random.normal(kx, (B, T, input_size), jnp.float32)

    params = init_params(key, input_size, hidden_size, lstm_hidden_size, output_size, nlayers)
    flat_params = pack_params(params, nlayers, lstm_hidden_size)

    out = lstm_net_forward(
        x, flat_params,
        nlayers=nlayers, lstm_hidden_size=lstm_hidden_size, output_size=output_size,
    )
    out = jax.block_until_ready(out)

    ref = lstm_net_reference(x, params, nlayers, lstm_hidden_size)
    assert out.shape == (B, output_size), out.shape
    # Tolerance loosened vs. the all-f32 version: matmul operands are bf16
    # (f32 accumulation / gate math), per the performance review.
    np.testing.assert_allclose(np.asarray(out), np.asarray(ref), rtol=3e-2, atol=3e-2)

    print("KERNEL_OK")
</pallas_src>

<mosaic_0001>
module attributes {stable_mosaic.version = 11 : i64} {
  func.func @kernel(%arg0: memref<2x8x16xf32, #tpu.memory_space<vmem>>, %arg1: memref<16x128xbf16, #tpu.memory_space<vmem>>, %arg2: memref<32x128xbf16, #tpu.memory_space<vmem>>, %arg3: memref<1x128xf32, #tpu.memory_space<vmem>>, %arg4: memref<32x128xbf16, #tpu.memory_space<vmem>>, %arg5: memref<32x128xbf16, #tpu.memory_space<vmem>>, %arg6: memref<1x128xf32, #tpu.memory_space<vmem>>, %arg7: memref<32x32xbf16, #tpu.memory_space<vmem>>, %arg8: memref<1x32xf32, #tpu.memory_space<vmem>>, %arg9: memref<32x8xbf16, #tpu.memory_space<vmem>>, %arg10: memref<1x8xf32, #tpu.memory_space<vmem>>, %arg11: memref<2x8xf32, #tpu.memory_space<vmem>>) attributes {dimension_semantics = [], scalar_prefetch = 0 : i64, scratch_operands = 0 : i64, tpu.core_type = #tpu.core_type<tc>} {
    %c0 = arith.constant 0 : index
    %c0_0 = arith.constant 0 : index
    %c0_1 = arith.constant 0 : index
    %0 = vector.load %arg0[%c0, %c0_0, %c0_1] : memref<2x8x16xf32, #tpu.memory_space<vmem>>, vector<2x8x16xf32>
    %1 = vector.shape_cast %0 : vector<2x8x16xf32> to vector<16x16xf32>
    %2 = arith.truncf %1 : vector<16x16xf32> to vector<16x16xbf16>
    %c0_2 = arith.constant 0 : index
    %c0_3 = arith.constant 0 : index
    %3 = vector.load %arg1[%c0_2, %c0_3] : memref<16x128xbf16, #tpu.memory_space<vmem>>, vector<16x128xbf16>
    %c0_4 = arith.constant 0 : index
    %c0_5 = arith.constant 0 : index
    %4 = vector.load %arg2[%c0_4, %c0_5] : memref<32x128xbf16, #tpu.memory_space<vmem>>, vector<32x128xbf16>
    %c0_6 = arith.constant 0 : index
    %c0_7 = arith.constant 0 : index
    %5 = vector.load %arg3[%c0_6, %c0_7] : memref<1x128xf32, #tpu.memory_space<vmem>>, vector<1x128xf32>
    %cst = arith.constant dense<0.000000e+00> : vector<16x128xf32>
    %6 = tpu.matmul %2, %3, %cst {dimension_numbers = #tpu.dot_dimension_numbers<[1], [0], [0], [1], [0, 0, 1, 1], [], []>} : vector<16x16xbf16>, vector<16x128xbf16>, vector<16x128xf32> -> vector<16x128xf32>
    %7 = vector.broadcast %5 : vector<1x128xf32> to vector<16x128xf32>
    %8 = arith.addf %6, %7 : vector<16x128xf32>
    %9 = vector.shape_cast %8 : vector<16x128xf32> to vector<2x8x128xf32>
    %10 = vector.extract_strided_slice %9 {offsets = [0, 0, 0], sizes = [2, 1, 128], strides = [1, 1, 1]} : vector<2x8x128xf32> to vector<2x1x128xf32>
    %11 = vector.shape_cast %10 : vector<2x1x128xf32> to vector<2x128xf32>
    %12 = vector.extract_strided_slice %9 {offsets = [0, 1, 0], sizes = [2, 1, 128], strides = [1, 1, 1]} : vector<2x8x128xf32> to vector<2x1x128xf32>
    %13 = vector.shape_cast %12 : vector<2x1x128xf32> to vector<2x128xf32>
    %14 = vector.extract_strided_slice %9 {offsets = [0, 2, 0], sizes = [2, 1, 128], strides = [1, 1, 1]} : vector<2x8x128xf32> to vector<2x1x128xf32>
    %15 = vector.shape_cast %14 : vector<2x1x128xf32> to vector<2x128xf32>
    %16 = vector.extract_strided_slice %9 {offsets = [0, 3, 0], sizes = [2, 1, 128], strides = [1, 1, 1]} : vector<2x8x128xf32> to vector<2x1x128xf32>
    %17 = vector.shape_cast %16 : vector<2x1x128xf32> to vector<2x128xf32>
    %18 = vector.extract_strided_slice %9 {offsets = [0, 4, 0], sizes = [2, 1, 128], strides = [1, 1, 1]} : vector<2x8x128xf32> to vector<2x1x128xf32>
    %19 = vector.shape_cast %18 : vector<2x1x128xf32> to vector<2x128xf32>
    %20 = vector.extract_strided_slice %9 {offsets = [0, 5, 0], sizes = [2, 1, 128], strides = [1, 1, 1]} : vector<2x8x128xf32> to vector<2x1x128xf32>
    %21 = vector.shape_cast %20 : vector<2x1x128xf32> to vector<2x128xf32>
    %22 = vector.extract_strided_slice %9 {offsets = [0, 6, 0], sizes = [2, 1, 128], strides = [1, 1, 1]} : vector<2x8x128xf32> to vector<2x1x128xf32>
    %23 = vector.shape_cast %22 : vector<2x1x128xf32> to vector<2x128xf32>
    %24 = vector.extract_strided_slice %9 {offsets = [0, 7, 0], sizes = [2, 1, 128], strides = [1, 1, 1]} : vector<2x8x128xf32> to vector<2x1x128xf32>
    %25 = vector.shape_cast %24 : vector<2x1x128xf32> to vector<2x128xf32>
    %cst_8 = arith.constant 0.000000e+00 : f32
    %26 = vector.broadcast %cst_8 : f32 to vector<2x32xf32>
    %cst_9 = arith.constant 0.000000e+00 : f32
    %27 = vector.broadcast %cst_9 : f32 to vector<2x32xf32>
    %28 = arith.truncf %26 : vector<2x32xf32> to vector<2x32xbf16>
    %cst_10 = arith.constant dense<0.000000e+00> : vector<2x128xf32>
    %29 = tpu.matmul %28, %4, %cst_10 {dimension_numbers = #tpu.dot_dimension_numbers<[1], [0], [0], [1], [0, 0, 1, 1], [], []>} : vector<2x32xbf16>, vector<32x128xbf16>, vector<2x128xf32> -> vector<2x128xf32>
    %30 = arith.addf %11, %29 : vector<2x128xf32>
    %31 = vector.extract_strided_slice %30 {offsets = [0, 0], sizes = [2, 32], strides = [1, 1]} : vector<2x128xf32> to vector<2x32xf32>
    %32 = arith.negf %31 : vector<2x32xf32>
    %33 = math.exp %32 : vector<2x32xf32>
    %cst_11 = arith.constant 1.000000e+00 : f32
    %34 = vector.broadcast %cst_11 : f32 to vector<2x32xf32>
    %35 = arith.addf %34, %33 : vector<2x32xf32>
    %36 = arith.divf %34, %35 : vector<2x32xf32>
    %37 = vector.extract_strided_slice %30 {offsets = [0, 32], sizes = [2, 32], strides = [1, 1]} : vector<2x128xf32> to vector<2x32xf32>
    %38 = arith.negf %37 : vector<2x32xf32>
    %39 = math.exp %38 : vector<2x32xf32>
    %cst_12 = arith.constant 1.000000e+00 : f32
    %40 = vector.broadcast %cst_12 : f32 to vector<2x32xf32>
    %41 = arith.addf %40, %39 : vector<2x32xf32>
    %42 = arith.divf %40, %41 : vector<2x32xf32>
    %43 = vector.extract_strided_slice %30 {offsets = [0, 64], sizes = [2, 32], strides = [1, 1]} : vector<2x128xf32> to vector<2x32xf32>
    %44 = math.tanh %43 : vector<2x32xf32>
    %45 = vector.extract_strided_slice %30 {offsets = [0, 96], sizes = [2, 32], strides = [1, 1]} : vector<2x128xf32> to vector<2x32xf32>
    %46 = arith.negf %45 : vector<2x32xf32>
    %47 = math.exp %46 : vector<2x32xf32>
    %cst_13 = arith.constant 1.000000e+00 : f32
    %48 = vector.broadcast %cst_13 : f32 to vector<2x32xf32>
    %49 = arith.addf %48, %47 : vector<2x32xf32>
    %50 = arith.divf %48, %49 : vector<2x32xf32>
    %51 = arith.mulf %42, %27 : vector<2x32xf32>
    %52 = arith.mulf %36, %44 : vector<2x32xf32>
    %53 = arith.addf %51, %52 : vector<2x32xf32>
    %54 = math.tanh %53 : vector<2x32xf32>
    %55 = arith.mulf %50, %54 : vector<2x32xf32>
    %56 = arith.truncf %55 : vector<2x32xf32> to vector<2x32xbf16>
    %cst_14 = arith.constant dense<0.000000e+00> : vector<2x128xf32>
    %57 = tpu.matmul %56, %4, %cst_14 {dimension_numbers = #tpu.dot_dimension_numbers<[1], [0], [0], [1], [0, 0, 1, 1], [], []>} : vector<2x32xbf16>, vector<32x128xbf16>, vector<2x128xf32> -> vector<2x128xf32>
    %58 = arith.addf %13, %57 : vector<2x128xf32>
    %59 = vector.extract_strided_slice %58 {offsets = [0, 0], sizes = [2, 32], strides = [1, 1]} : vector<2x128xf32> to vector<2x32xf32>
    %60 = arith.negf %59 : vector<2x32xf32>
    %61 = math.exp %60 : vector<2x32xf32>
    %cst_15 = arith.constant 1.000000e+00 : f32
    %62 = vector.broadcast %cst_15 : f32 to vector<2x32xf32>
    %63 = arith.addf %62, %61 : vector<2x32xf32>
    %64 = arith.divf %62, %63 : vector<2x32xf32>
    %65 = vector.extract_strided_slice %58 {offsets = [0, 32], sizes = [2, 32], strides = [1, 1]} : vector<2x128xf32> to vector<2x32xf32>
    %66 = arith.negf %65 : vector<2x32xf32>
    %67 = math.exp %66 : vector<2x32xf32>
    %cst_16 = arith.constant 1.000000e+00 : f32
    %68 = vector.broadcast %cst_16 : f32 to vector<2x32xf32>
    %69 = arith.addf %68, %67 : vector<2x32xf32>
    %70 = arith.divf %68, %69 : vector<2x32xf32>
    %71 = vector.extract_strided_slice %58 {offsets = [0, 64], sizes = [2, 32], strides = [1, 1]} : vector<2x128xf32> to vector<2x32xf32>
    %72 = math.tanh %71 : vector<2x32xf32>
    %73 = vector.extract_strided_slice %58 {offsets = [0, 96], sizes = [2, 32], strides = [1, 1]} : vector<2x128xf32> to vector<2x32xf32>
    %74 = arith.negf %73 : vector<2x32xf32>
    %75 = math.exp %74 : vector<2x32xf32>
    %cst_17 = arith.constant 1.000000e+00 : f32
    %76 = vector.broadcast %cst_17 : f32 to vector<2x32xf32>
    %77 = arith.addf %76, %75 : vector<2x32xf32>
    %78 = arith.divf %76, %77 : vector<2x32xf32>
    %79 = arith.mulf %70, %53 : vector<2x32xf32>
    %80 = arith.mulf %64, %72 : vector<2x32xf32>
    %81 = arith.addf %79, %80 : vector<2x32xf32>
    %82 = math.tanh %81 : vector<2x32xf32>
    %83 = arith.mulf %78, %82 : vector<2x32xf32>
    %84 = arith.truncf %83 : vector<2x32xf32> to vector<2x32xbf16>
    %cst_18 = arith.constant dense<0.000000e+00> : vector<2x128xf32>
    %85 = tpu.matmul %84, %4, %cst_18 {dimension_numbers = #tpu.dot_dimension_numbers<[1], [0], [0], [1], [0, 0, 1, 1], [], []>} : vector<2x32xbf16>, vector<32x128xbf16>, vector<2x128xf32> -> vector<2x128xf32>
    %86 = arith.addf %15, %85 : vector<2x128xf32>
    %87 = vector.extract_strided_slice %86 {offsets = [0, 0], sizes = [2, 32], strides = [1, 1]} : vector<2x128xf32> to vector<2x32xf32>
    %88 = arith.negf %87 : vector<2x32xf32>
    %89 = math.exp %88 : vector<2x32xf32>
    %cst_19 = arith.constant 1.000000e+00 : f32
    %90 = vector.broadcast %cst_19 : f32 to vector<2x32xf32>
    %91 = arith.addf %90, %89 : vector<2x32xf32>
    %92 = arith.divf %90, %91 : vector<2x32xf32>
    %93 = vector.extract_strided_slice %86 {offsets = [0, 32], sizes = [2, 32], strides = [1, 1]} : vector<2x128xf32> to vector<2x32xf32>
    %94 = arith.negf %93 : vector<2x32xf32>
    %95 = math.exp %94 : vector<2x32xf32>
    %cst_20 = arith.constant 1.000000e+00 : f32
    %96 = vector.broadcast %cst_20 : f32 to vector<2x32xf32>
    %97 = arith.addf %96, %95 : vector<2x32xf32>
    %98 = arith.divf %96, %97 : vector<2x32xf32>
    %99 = vector.extract_strided_slice %86 {offsets = [0, 64], sizes = [2, 32], strides = [1, 1]} : vector<2x128xf32> to vector<2x32xf32>
    %100 = math.tanh %99 : vector<2x32xf32>
    %101 = vector.extract_strided_slice %86 {offsets = [0, 96], sizes = [2, 32], strides = [1, 1]} : vector<2x128xf32> to vector<2x32xf32>
    %102 = arith.negf %101 : vector<2x32xf32>
    %103 = math.exp %102 : vector<2x32xf32>
    %cst_21 = arith.constant 1.000000e+00 : f32
    %104 = vector.broadcast %cst_21 : f32 to vector<2x32xf32>
    %105 = arith.addf %104, %103 : vector<2x32xf32>
    %106 = arith.divf %104, %105 : vector<2x32xf32>
    %107 = arith.mulf %98, %81 : vector<2x32xf32>
    %108 = arith.mulf %92, %100 : vector<2x32xf32>
    %109 = arith.addf %107, %108 : vector<2x32xf32>
    %110 = math.tanh %109 : vector<2x32xf32>
    %111 = arith.mulf %106, %110 : vector<2x32xf32>
    %112 = arith.truncf %111 : vector<2x32xf32> to vector<2x32xbf16>
    %cst_22 = arith.constant dense<0.000000e+00> : vector<2x128xf32>
    %113 = tpu.matmul %112, %4, %cst_22 {dimension_numbers = #tpu.dot_dimension_numbers<[1], [0], [0], [1], [0, 0, 1, 1], [], []>} : vector<2x32xbf16>, vector<32x128xbf16>, vector<2x128xf32> -> vector<2x128xf32>
    %114 = arith.addf %17, %113 : vector<2x128xf32>
    %115 = vector.extract_strided_slice %114 {offsets = [0, 0], sizes = [2, 32], strides = [1, 1]} : vector<2x128xf32> to vector<2x32xf32>
    %116 = arith.negf %115 : vector<2x32xf32>
    %117 = math.exp %116 : vector<2x32xf32>
    %cst_23 = arith.constant 1.000000e+00 : f32
    %118 = vector.broadcast %cst_23 : f32 to vector<2x32xf32>
    %119 = arith.addf %118, %117 : vector<2x32xf32>
    %120 = arith.divf %118, %119 : vector<2x32xf32>
    %121 = vector.extract_strided_slice %114 {offsets = [0, 32], sizes = [2, 32], strides = [1, 1]} : vector<2x128xf32> to vector<2x32xf32>
    %122 = arith.negf %121 : vector<2x32xf32>
    %123 = math.exp %122 : vector<2x32xf32>
    %cst_24 = arith.constant 1.000000e+00 : f32
    %124 = vector.broadcast %cst_24 : f32 to vector<2x32xf32>
    %125 = arith.addf %124, %123 : vector<2x32xf32>
    %126 = arith.divf %124, %125 : vector<2x32xf32>
    %127 = vector.extract_strided_slice %114 {offsets = [0, 64], sizes = [2, 32], strides = [1, 1]} : vector<2x128xf32> to vector<2x32xf32>
    %128 = math.tanh %127 : vector<2x32xf32>
    %129 = vector.extract_strided_slice %114 {offsets = [0, 96], sizes = [2, 32], strides = [1, 1]} : vector<2x128xf32> to vector<2x32xf32>
    %130 = arith.negf %129 : vector<2x32xf32>
    %131 = math.exp %130 : vector<2x32xf32>
    %cst_25 = arith.constant 1.000000e+00 : f32
    %132 = vector.broadcast %cst_25 : f32 to vector<2x32xf32>
    %133 = arith.addf %132, %131 : vector<2x32xf32>
    %134 = arith.divf %132, %133 : vector<2x32xf32>
    %135 = arith.mulf %126, %109 : vector<2x32xf32>
    %136 = arith.mulf %120, %128 : vector<2x32xf32>
    %137 = arith.addf %135, %136 : vector<2x32xf32>
    %138 = math.tanh %137 : vector<2x32xf32>
    %139 = arith.mulf %134, %138 : vector<2x32xf32>
    %140 = arith.truncf %139 : vector<2x32xf32> to vector<2x32xbf16>
    %cst_26 = arith.constant dense<0.000000e+00> : vector<2x128xf32>
    %141 = tpu.matmul %140, %4, %cst_26 {dimension_numbers = #tpu.dot_dimension_numbers<[1], [0], [0], [1], [0, 0, 1, 1], [], []>} : vector<2x32xbf16>, vector<32x128xbf16>, vector<2x128xf32> -> vector<2x128xf32>
    %142 = arith.addf %19, %141 : vector<2x128xf32>
    %143 = vector.extract_strided_slice %142 {offsets = [0, 0], sizes = [2, 32], strides = [1, 1]} : vector<2x128xf32> to vector<2x32xf32>
    %144 = arith.negf %143 : vector<2x32xf32>
    %145 = math.exp %144 : vector<2x32xf32>
    %cst_27 = arith.constant 1.000000e+00 : f32
    %146 = vector.broadcast %cst_27 : f32 to vector<2x32xf32>
    %147 = arith.addf %146, %145 : vector<2x32xf32>
    %148 = arith.divf %146, %147 : vector<2x32xf32>
    %149 = vector.extract_strided_slice %142 {offsets = [0, 32], sizes = [2, 32], strides = [1, 1]} : vector<2x128xf32> to vector<2x32xf32>
    %150 = arith.negf %149 : vector<2x32xf32>
    %151 = math.exp %150 : vector<2x32xf32>
    %cst_28 = arith.constant 1.000000e+00 : f32
    %152 = vector.broadcast %cst_28 : f32 to vector<2x32xf32>
    %153 = arith.addf %152, %151 : vector<2x32xf32>
    %154 = arith.divf %152, %153 : vector<2x32xf32>
    %155 = vector.extract_strided_slice %142 {offsets = [0, 64], sizes = [2, 32], strides = [1, 1]} : vector<2x128xf32> to vector<2x32xf32>
    %156 = math.tanh %155 : vector<2x32xf32>
    %157 = vector.extract_strided_slice %142 {offsets = [0, 96], sizes = [2, 32], strides = [1, 1]} : vector<2x128xf32> to vector<2x32xf32>
    %158 = arith.negf %157 : vector<2x32xf32>
    %159 = math.exp %158 : vector<2x32xf32>
    %cst_29 = arith.constant 1.000000e+00 : f32
    %160 = vector.broadcast %cst_29 : f32 to vector<2x32xf32>
    %161 = arith.addf %160, %159 : vector<2x32xf32>
    %162 = arith.divf %160, %161 : vector<2x32xf32>
    %163 = arith.mulf %154, %137 : vector<2x32xf32>
    %164 = arith.mulf %148, %156 : vector<2x32xf32>
    %165 = arith.addf %163, %164 : vector<2x32xf32>
    %166 = math.tanh %165 : vector<2x32xf32>
    %167 = arith.mulf %162, %166 : vector<2x32xf32>
    %168 = arith.truncf %167 : vector<2x32xf32> to vector<2x32xbf16>
    %cst_30 = arith.constant dense<0.000000e+00> : vector<2x128xf32>
    %169 = tpu.matmul %168, %4, %cst_30 {dimension_numbers = #tpu.dot_dimension_numbers<[1], [0], [0], [1], [0, 0, 1, 1], [], []>} : vector<2x32xbf16>, vector<32x128xbf16>, vector<2x128xf32> -> vector<2x128xf32>
    %170 = arith.addf %21, %169 : vector<2x128xf32>
    %171 = vector.extract_strided_slice %170 {offsets = [0, 0], sizes = [2, 32], strides = [1, 1]} : vector<2x128xf32> to vector<2x32xf32>
    %172 = arith.negf %171 : vector<2x32xf32>
    %173 = math.exp %172 : vector<2x32xf32>
    %cst_31 = arith.constant 1.000000e+00 : f32
    %174 = vector.broadcast %cst_31 : f32 to vector<2x32xf32>
    %175 = arith.addf %174, %173 : vector<2x32xf32>
    %176 = arith.divf %174, %175 : vector<2x32xf32>
    %177 = vector.extract_strided_slice %170 {offsets = [0, 32], sizes = [2, 32], strides = [1, 1]} : vector<2x128xf32> to vector<2x32xf32>
    %178 = arith.negf %177 : vector<2x32xf32>
    %179 = math.exp %178 : vector<2x32xf32>
    %cst_32 = arith.constant 1.000000e+00 : f32
    %180 = vector.broadcast %cst_32 : f32 to vector<2x32xf32>
    %181 = arith.addf %180, %179 : vector<2x32xf32>
    %182 = arith.divf %180, %181 : vector<2x32xf32>
    %183 = vector.extract_strided_slice %170 {offsets = [0, 64], sizes = [2, 32], strides = [1, 1]} : vector<2x128xf32> to vector<2x32xf32>
    %184 = math.tanh %183 : vector<2x32xf32>
    %185 = vector.extract_strided_slice %170 {offsets = [0, 96], sizes = [2, 32], strides = [1, 1]} : vector<2x128xf32> to vector<2x32xf32>
    %186 = arith.negf %185 : vector<2x32xf32>
    %187 = math.exp %186 : vector<2x32xf32>
    %cst_33 = arith.constant 1.000000e+00 : f32
    %188 = vector.broadcast %cst_33 : f32 to vector<2x32xf32>
    %189 = arith.addf %188, %187 : vector<2x32xf32>
    %190 = arith.divf %188, %189 : vector<2x32xf32>
    %191 = arith.mulf %182, %165 : vector<2x32xf32>
    %192 = arith.mulf %176, %184 : vector<2x32xf32>
    %193 = arith.addf %191, %192 : vector<2x32xf32>
    %194 = math.tanh %193 : vector<2x32xf32>
    %195 = arith.mulf %190, %194 : vector<2x32xf32>
    %196 = arith.truncf %195 : vector<2x32xf32> to vector<2x32xbf16>
    %cst_34 = arith.constant dense<0.000000e+00> : vector<2x128xf32>
    %197 = tpu.matmul %196, %4, %cst_34 {dimension_numbers = #tpu.dot_dimension_numbers<[1], [0], [0], [1], [0, 0, 1, 1], [], []>} : vector<2x32xbf16>, vector<32x128xbf16>, vector<2x128xf32> -> vector<2x128xf32>
    %198 = arith.addf %23, %197 : vector<2x128xf32>
    %199 = vector.extract_strided_slice %198 {offsets = [0, 0], sizes = [2, 32], strides = [1, 1]} : vector<2x128xf32> to vector<2x32xf32>
    %200 = arith.negf %199 : vector<2x32xf32>
    %201 = math.exp %200 : vector<2x32xf32>
    %cst_35 = arith.constant 1.000000e+00 : f32
    %202 = vector.broadcast %cst_35 : f32 to vector<2x32xf32>
    %203 = arith.addf %202, %201 : vector<2x32xf32>
    %204 = arith.divf %202, %203 : vector<2x32xf32>
    %205 = vector.extract_strided_slice %198 {offsets = [0, 32], sizes = [2, 32], strides = [1, 1]} : vector<2x128xf32> to vector<2x32xf32>
    %206 = arith.negf %205 : vector<2x32xf32>
    %207 = math.exp %206 : vector<2x32xf32>
    %cst_36 = arith.constant 1.000000e+00 : f32
    %208 = vector.broadcast %cst_36 : f32 to vector<2x32xf32>
    %209 = arith.addf %208, %207 : vector<2x32xf32>
    %210 = arith.divf %208, %209 : vector<2x32xf32>
    %211 = vector.extract_strided_slice %198 {offsets = [0, 64], sizes = [2, 32], strides = [1, 1]} : vector<2x128xf32> to vector<2x32xf32>
    %212 = math.tanh %211 : vector<2x32xf32>
    %213 = vector.extract_strided_slice %198 {offsets = [0, 96], sizes = [2, 32], strides = [1, 1]} : vector<2x128xf32> to vector<2x32xf32>
    %214 = arith.negf %213 : vector<2x32xf32>
    %215 = math.exp %214 : vector<2x32xf32>
    %cst_37 = arith.constant 1.000000e+00 : f32
    %216 = vector.broadcast %cst_37 : f32 to vector<2x32xf32>
    %217 = arith.addf %216, %215 : vector<2x32xf32>
    %218 = arith.divf %216, %217 : vector<2x32xf32>
    %219 = arith.mulf %210, %193 : vector<2x32xf32>
    %220 = arith.mulf %204, %212 : vector<2x32xf32>
    %221 = arith.addf %219, %220 : vector<2x32xf32>
    %222 = math.tanh %221 : vector<2x32xf32>
    %223 = arith.mulf %218, %222 : vector<2x32xf32>
    %224 = arith.truncf %223 : vector<2x32xf32> to vector<2x32xbf16>
    %cst_38 = arith.constant dense<0.000000e+00> : vector<2x128xf32>
    %225 = tpu.matmul %224, %4, %cst_38 {dimension_numbers = #tpu.dot_dimension_numbers<[1], [0], [0], [1], [0, 0, 1, 1], [], []>} : vector<2x32xbf16>, vector<32x128xbf16>, vector<2x128xf32> -> vector<2x128xf32>
    %226 = arith.addf %25, %225 : vector<2x128xf32>
    %227 = vector.extract_strided_slice %226 {offsets = [0, 0], sizes = [2, 32], strides = [1, 1]} : vector<2x128xf32> to vector<2x32xf32>
    %228 = arith.negf %227 : vector<2x32xf32>
    %229 = math.exp %228 : vector<2x32xf32>
    %cst_39 = arith.constant 1.000000e+00 : f32
    %230 = vector.broadcast %cst_39 : f32 to vector<2x32xf32>
    %231 = arith.addf %230, %229 : vector<2x32xf32>
    %232 = arith.divf %230, %231 : vector<2x32xf32>
    %233 = vector.extract_strided_slice %226 {offsets = [0, 32], sizes = [2, 32], strides = [1, 1]} : vector<2x128xf32> to vector<2x32xf32>
    %234 = arith.negf %233 : vector<2x32xf32>
    %235 = math.exp %234 : vector<2x32xf32>
    %cst_40 = arith.constant 1.000000e+00 : f32
    %236 = vector.broadcast %cst_40 : f32 to vector<2x32xf32>
    %237 = arith.addf %236, %235 : vector<2x32xf32>
    %238 = arith.divf %236, %237 : vector<2x32xf32>
    %239 = vector.extract_strided_slice %226 {offsets = [0, 64], sizes = [2, 32], strides = [1, 1]} : vector<2x128xf32> to vector<2x32xf32>
    %240 = math.tanh %239 : vector<2x32xf32>
    %241 = vector.extract_strided_slice %226 {offsets = [0, 96], sizes = [2, 32], strides = [1, 1]} : vector<2x128xf32> to vector<2x32xf32>
    %242 = arith.negf %241 : vector<2x32xf32>
    %243 = math.exp %242 : vector<2x32xf32>
    %cst_41 = arith.constant 1.000000e+00 : f32
    %244 = vector.broadcast %cst_41 : f32 to vector<2x32xf32>
    %245 = arith.addf %244, %243 : vector<2x32xf32>
    %246 = arith.divf %244, %245 : vector<2x32xf32>
    %247 = arith.mulf %238, %221 : vector<2x32xf32>
    %248 = arith.mulf %232, %240 : vector<2x32xf32>
    %249 = arith.addf %247, %248 : vector<2x32xf32>
    %250 = math.tanh %249 : vector<2x32xf32>
    %251 = arith.mulf %246, %250 : vector<2x32xf32>
    %252 = arith.truncf %251 : vector<2x32xf32> to vector<2x32xbf16>
    %c0_42 = arith.constant 0 : index
    %c0_43 = arith.constant 0 : index
    %253 = vector.load %arg4[%c0_42, %c0_43] : memref<32x128xbf16, #tpu.memory_space<vmem>>, vector<32x128xbf16>
    %c0_44 = arith.constant 0 : index
    %c0_45 = arith.constant 0 : index
    %254 = vector.load %arg5[%c0_44, %c0_45] : memref<32x128xbf16, #tpu.memory_space<vmem>>, vector<32x128xbf16>
    %c0_46 = arith.constant 0 : index
    %c0_47 = arith.constant 0 : index
    %255 = vector.load %arg6[%c0_46, %c0_47] : memref<1x128xf32, #tpu.memory_space<vmem>>, vector<1x128xf32>
    %cst_48 = arith.constant dense<0.000000e+00> : vector<2x128xf32>
    %256 = tpu.matmul %56, %253, %cst_48 {dimension_numbers = #tpu.dot_dimension_numbers<[1], [0], [0], [1], [0, 0, 1, 1], [], []>} : vector<2x32xbf16>, vector<32x128xbf16>, vector<2x128xf32> -> vector<2x128xf32>
    %257 = vector.broadcast %255 : vector<1x128xf32> to vector<2x128xf32>
    %258 = arith.addf %256, %257 : vector<2x128xf32>
    %cst_49 = arith.constant dense<0.000000e+00> : vector<2x128xf32>
    %259 = tpu.matmul %84, %253, %cst_49 {dimension_numbers = #tpu.dot_dimension_numbers<[1], [0], [0], [1], [0, 0, 1, 1], [], []>} : vector<2x32xbf16>, vector<32x128xbf16>, vector<2x128xf32> -> vector<2x128xf32>
    %260 = vector.broadcast %255 : vector<1x128xf32> to vector<2x128xf32>
    %261 = arith.addf %259, %260 : vector<2x128xf32>
    %cst_50 = arith.constant dense<0.000000e+00> : vector<2x128xf32>
    %262 = tpu.matmul %112, %253, %cst_50 {dimension_numbers = #tpu.dot_dimension_numbers<[1], [0], [0], [1], [0, 0, 1, 1], [], []>} : vector<2x32xbf16>, vector<32x128xbf16>, vector<2x128xf32> -> vector<2x128xf32>
    %263 = vector.broadcast %255 : vector<1x128xf32> to vector<2x128xf32>
    %264 = arith.addf %262, %263 : vector<2x128xf32>
    %cst_51 = arith.constant dense<0.000000e+00> : vector<2x128xf32>
    %265 = tpu.matmul %140, %253, %cst_51 {dimension_numbers = #tpu.dot_dimension_numbers<[1], [0], [0], [1], [0, 0, 1, 1], [], []>} : vector<2x32xbf16>, vector<32x128xbf16>, vector<2x128xf32> -> vector<2x128xf32>
    %266 = vector.broadcast %255 : vector<1x128xf32> to vector<2x128xf32>
    %267 = arith.addf %265, %266 : vector<2x128xf32>
    %cst_52 = arith.constant dense<0.000000e+00> : vector<2x128xf32>
    %268 = tpu.matmul %168, %253, %cst_52 {dimension_numbers = #tpu.dot_dimension_numbers<[1], [0], [0], [1], [0, 0, 1, 1], [], []>} : vector<2x32xbf16>, vector<32x128xbf16>, vector<2x128xf32> -> vector<2x128xf32>
    %269 = vector.broadcast %255 : vector<1x128xf32> to vector<2x128xf32>
    %270 = arith.addf %268, %269 : vector<2x128xf32>
    %cst_53 = arith.constant dense<0.000000e+00> : vector<2x128xf32>
    %271 = tpu.matmul %196, %253, %cst_53 {dimension_numbers = #tpu.dot_dimension_numbers<[1], [0], [0], [1], [0, 0, 1, 1], [], []>} : vector<2x32xbf16>, vector<32x128xbf16>, vector<2x128xf32> -> vector<2x128xf32>
    %272 = vector.broadcast %255 : vector<1x128xf32> to vector<2x128xf32>
    %273 = arith.addf %271, %272 : vector<2x128xf32>
    %cst_54 = arith.constant dense<0.000000e+00> : vector<2x128xf32>
    %274 = tpu.matmul %224, %253, %cst_54 {dimension_numbers = #tpu.dot_dimension_numbers<[1], [0], [0], [1], [0, 0, 1, 1], [], []>} : vector<2x32xbf16>, vector<32x128xbf16>, vector<2x128xf32> -> vector<2x128xf32>
    %275 = vector.broadcast %255 : vector<1x128xf32> to vector<2x128xf32>
    %276 = arith.addf %274, %275 : vector<2x128xf32>
    %cst_55 = arith.constant dense<0.000000e+00> : vector<2x128xf32>
    %277 = tpu.matmul %252, %253, %cst_55 {dimension_numbers = #tpu.dot_dimension_numbers<[1], [0], [0], [1], [0, 0, 1, 1], [], []>} : vector<2x32xbf16>, vector<32x128xbf16>, vector<2x128xf32> -> vector<2x128xf32>
    %278 = vector.broadcast %255 : vector<1x128xf32> to vector<2x128xf32>
    %279 = arith.addf %277, %278 : vector<2x128xf32>
    %cst_56 = arith.constant 0.000000e+00 : f32
    %280 = vector.broadcast %cst_56 : f32 to vector<2x32xf32>
    %cst_57 = arith.constant 0.000000e+00 : f32
    %281 = vector.broadcast %cst_57 : f32 to vector<2x32xf32>
    %282 = arith.truncf %280 : vector<2x32xf32> to vector<2x32xbf16>
    %cst_58 = arith.constant dense<0.000000e+00> : vector<2x128xf32>
    %283 = tpu.matmul %282, %254, %cst_58 {dimension_numbers = #tpu.dot_dimension_numbers<[1], [0], [0], [1], [0, 0, 1, 1], [], []>} : vector<2x32xbf16>, vector<32x128xbf16>, vector<2x128xf32> -> vector<2x128xf32>
    %284 = arith.addf %258, %283 : vector<2x128xf32>
    %285 = vector.extract_strided_slice %284 {offsets = [0, 0], sizes = [2, 32], strides = [1, 1]} : vector<2x128xf32> to vector<2x32xf32>
    %286 = arith.negf %285 : vector<2x32xf32>
    %287 = math.exp %286 : vector<2x32xf32>
    %cst_59 = arith.constant 1.000000e+00 : f32
    %288 = vector.broadcast %cst_59 : f32 to vector<2x32xf32>
    %289 = arith.addf %288, %287 : vector<2x32xf32>
    %290 = arith.divf %288, %289 : vector<2x32xf32>
    %291 = vector.extract_strided_slice %284 {offsets = [0, 32], sizes = [2, 32], strides = [1, 1]} : vector<2x128xf32> to vector<2x32xf32>
    %292 = arith.negf %291 : vector<2x32xf32>
    %293 = math.exp %292 : vector<2x32xf32>
    %cst_60 = arith.constant 1.000000e+00 : f32
    %294 = vector.broadcast %cst_60 : f32 to vector<2x32xf32>
    %295 = arith.addf %294, %293 : vector<2x32xf32>
    %296 = arith.divf %294, %295 : vector<2x32xf32>
    %297 = vector.extract_strided_slice %284 {offsets = [0, 64], sizes = [2, 32], strides = [1, 1]} : vector<2x128xf32> to vector<2x32xf32>
    %298 = math.tanh %297 : vector<2x32xf32>
    %299 = vector.extract_strided_slice %284 {offsets = [0, 96], sizes = [2, 32], strides = [1, 1]} : vector<2x128xf32> to vector<2x32xf32>
    %300 = arith.negf %299 : vector<2x32xf32>
    %301 = math.exp %300 : vector<2x32xf32>
    %cst_61 = arith.constant 1.000000e+00 : f32
    %302 = vector.broadcast %cst_61 : f32 to vector<2x32xf32>
    %303 = arith.addf %302, %301 : vector<2x32xf32>
    %304 = arith.divf %302, %303 : vector<2x32xf32>
    %305 = arith.mulf %296, %281 : vector<2x32xf32>
    %306 = arith.mulf %290, %298 : vector<2x32xf32>
    %307 = arith.addf %305, %306 : vector<2x32xf32>
    %308 = math.tanh %307 : vector<2x32xf32>
    %309 = arith.mulf %304, %308 : vector<2x32xf32>
    %310 = arith.truncf %309 : vector<2x32xf32> to vector<2x32xbf16>
    %cst_62 = arith.constant dense<0.000000e+00> : vector<2x128xf32>
    %311 = tpu.matmul %310, %254, %cst_62 {dimension_numbers = #tpu.dot_dimension_numbers<[1], [0], [0], [1], [0, 0, 1, 1], [], []>} : vector<2x32xbf16>, vector<32x128xbf16>, vector<2x128xf32> -> vector<2x128xf32>
    %312 = arith.addf %261, %311 : vector<2x128xf32>
    %313 = vector.extract_strided_slice %312 {offsets = [0, 0], sizes = [2, 32], strides = [1, 1]} : vector<2x128xf32> to vector<2x32xf32>
    %314 = arith.negf %313 : vector<2x32xf32>
    %315 = math.exp %314 : vector<2x32xf32>
    %cst_63 = arith.constant 1.000000e+00 : f32
    %316 = vector.broadcast %cst_63 : f32 to vector<2x32xf32>
    %317 = arith.addf %316, %315 : vector<2x32xf32>
    %318 = arith.divf %316, %317 : vector<2x32xf32>
    %319 = vector.extract_strided_slice %312 {offsets = [0, 32], sizes = [2, 32], strides = [1, 1]} : vector<2x128xf32> to vector<2x32xf32>
    %320 = arith.negf %319 : vector<2x32xf32>
    %321 = math.exp %320 : vector<2x32xf32>
    %cst_64 = arith.constant 1.000000e+00 : f32
    %322 = vector.broadcast %cst_64 : f32 to vector<2x32xf32>
    %323 = arith.addf %322, %321 : vector<2x32xf32>
    %324 = arith.divf %322, %323 : vector<2x32xf32>
    %325 = vector.extract_strided_slice %312 {offsets = [0, 64], sizes = [2, 32], strides = [1, 1]} : vector<2x128xf32> to vector<2x32xf32>
    %326 = math.tanh %325 : vector<2x32xf32>
    %327 = vector.extract_strided_slice %312 {offsets = [0, 96], sizes = [2, 32], strides = [1, 1]} : vector<2x128xf32> to vector<2x32xf32>
    %328 = arith.negf %327 : vector<2x32xf32>
    %329 = math.exp %328 : vector<2x32xf32>
    %cst_65 = arith.constant 1.000000e+00 : f32
    %330 = vector.broadcast %cst_65 : f32 to vector<2x32xf32>
    %331 = arith.addf %330, %329 : vector<2x32xf32>
    %332 = arith.divf %330, %331 : vector<2x32xf32>
    %333 = arith.mulf %324, %307 : vector<2x32xf32>
    %334 = arith.mulf %318, %326 : vector<2x32xf32>
    %335 = arith.addf %333, %334 : vector<2x32xf32>
    %336 = math.tanh %335 : vector<2x32xf32>
    %337 = arith.mulf %332, %336 : vector<2x32xf32>
    %338 = arith.truncf %337 : vector<2x32xf32> to vector<2x32xbf16>
    %cst_66 = arith.constant dense<0.000000e+00> : vector<2x128xf32>
    %339 = tpu.matmul %338, %254, %cst_66 {dimension_numbers = #tpu.dot_dimension_numbers<[1], [0], [0], [1], [0, 0, 1, 1], [], []>} : vector<2x32xbf16>, vector<32x128xbf16>, vector<2x128xf32> -> vector<2x128xf32>
    %340 = arith.addf %264, %339 : vector<2x128xf32>
    %341 = vector.extract_strided_slice %340 {offsets = [0, 0], sizes = [2, 32], strides = [1, 1]} : vector<2x128xf32> to vector<2x32xf32>
    %342 = arith.negf %341 : vector<2x32xf32>
    %343 = math.exp %342 : vector<2x32xf32>
    %cst_67 = arith.constant 1.000000e+00 : f32
    %344 = vector.broadcast %cst_67 : f32 to vector<2x32xf32>
    %345 = arith.addf %344, %343 : vector<2x32xf32>
    %346 = arith.divf %344, %345 : vector<2x32xf32>
    %347 = vector.extract_strided_slice %340 {offsets = [0, 32], sizes = [2, 32], strides = [1, 1]} : vector<2x128xf32> to vector<2x32xf32>
    %348 = arith.negf %347 : vector<2x32xf32>
    %349 = math.exp %348 : vector<2x32xf32>
    %cst_68 = arith.constant 1.000000e+00 : f32
    %350 = vector.broadcast %cst_68 : f32 to vector<2x32xf32>
    %351 = arith.addf %350, %349 : vector<2x32xf32>
    %352 = arith.divf %350, %351 : vector<2x32xf32>
    %353 = vector.extract_strided_slice %340 {offsets = [0, 64], sizes = [2, 32], strides = [1, 1]} : vector<2x128xf32> to vector<2x32xf32>
    %354 = math.tanh %353 : vector<2x32xf32>
    %355 = vector.extract_strided_slice %340 {offsets = [0, 96], sizes = [2, 32], strides = [1, 1]} : vector<2x128xf32> to vector<2x32xf32>
    %356 = arith.negf %355 : vector<2x32xf32>
    %357 = math.exp %356 : vector<2x32xf32>
    %cst_69 = arith.constant 1.000000e+00 : f32
    %358 = vector.broadcast %cst_69 : f32 to vector<2x32xf32>
    %359 = arith.addf %358, %357 : vector<2x32xf32>
    %360 = arith.divf %358, %359 : vector<2x32xf32>
    %361 = arith.mulf %352, %335 : vector<2x32xf32>
    %362 = arith.mulf %346, %354 : vector<2x32xf32>
    %363 = arith.addf %361, %362 : vector<2x32xf32>
    %364 = math.tanh %363 : vector<2x32xf32>
    %365 = arith.mulf %360, %364 : vector<2x32xf32>
    %366 = arith.truncf %365 : vector<2x32xf32> to vector<2x32xbf16>
    %cst_70 = arith.constant dense<0.000000e+00> : vector<2x128xf32>
    %367 = tpu.matmul %366, %254, %cst_70 {dimension_numbers = #tpu.dot_dimension_numbers<[1], [0], [0], [1], [0, 0, 1, 1], [], []>} : vector<2x32xbf16>, vector<32x128xbf16>, vector<2x128xf32> -> vector<2x128xf32>
    %368 = arith.addf %267, %367 : vector<2x128xf32>
    %369 = vector.extract_strided_slice %368 {offsets = [0, 0], sizes = [2, 32], strides = [1, 1]} : vector<2x128xf32> to vector<2x32xf32>
    %370 = arith.negf %369 : vector<2x32xf32>
    %371 = math.exp %370 : vector<2x32xf32>
    %cst_71 = arith.constant 1.000000e+00 : f32
    %372 = vector.broadcast %cst_71 : f32 to vector<2x32xf32>
    %373 = arith.addf %372, %371 : vector<2x32xf32>
    %374 = arith.divf %372, %373 : vector<2x32xf32>
    %375 = vector.extract_strided_slice %368 {offsets = [0, 32], sizes = [2, 32], strides = [1, 1]} : vector<2x128xf32> to vector<2x32xf32>
    %376 = arith.negf %375 : vector<2x32xf32>
    %377 = math.exp %376 : vector<2x32xf32>
    %cst_72 = arith.constant 1.000000e+00 : f32
    %378 = vector.broadcast %cst_72 : f32 to vector<2x32xf32>
    %379 = arith.addf %378, %377 : vector<2x32xf32>
    %380 = arith.divf %378, %379 : vector<2x32xf32>
    %381 = vector.extract_strided_slice %368 {offsets = [0, 64], sizes = [2, 32], strides = [1, 1]} : vector<2x128xf32> to vector<2x32xf32>
    %382 = math.tanh %381 : vector<2x32xf32>
    %383 = vector.extract_strided_slice %368 {offsets = [0, 96], sizes = [2, 32], strides = [1, 1]} : vector<2x128xf32> to vector<2x32xf32>
    %384 = arith.negf %383 : vector<2x32xf32>
    %385 = math.exp %384 : vector<2x32xf32>
    %cst_73 = arith.constant 1.000000e+00 : f32
    %386 = vector.broadcast %cst_73 : f32 to vector<2x32xf32>
    %387 = arith.addf %386, %385 : vector<2x32xf32>
    %388 = arith.divf %386, %387 : vector<2x32xf32>
    %389 = arith.mulf %380, %363 : vector<2x32xf32>
    %390 = arith.mulf %374, %382 : vector<2x32xf32>
    %391 = arith.addf %389, %390 : vector<2x32xf32>
    %392 = math.tanh %391 : vector<2x32xf32>
    %393 = arith.mulf %388, %392 : vector<2x32xf32>
    %394 = arith.truncf %393 : vector<2x32xf32> to vector<2x32xbf16>
    %cst_74 = arith.constant dense<0.000000e+00> : vector<2x128xf32>
    %395 = tpu.matmul %394, %254, %cst_74 {dimension_numbers = #tpu.dot_dimension_numbers<[1], [0], [0], [1], [0, 0, 1, 1], [], []>} : vector<2x32xbf16>, vector<32x128xbf16>, vector<2x128xf32> -> vector<2x128xf32>
    %396 = arith.addf %270, %395 : vector<2x128xf32>
    %397 = vector.extract_strided_slice %396 {offsets = [0, 0], sizes = [2, 32], strides = [1, 1]} : vector<2x128xf32> to vector<2x32xf32>
    %398 = arith.negf %397 : vector<2x32xf32>
    %399 = math.exp %398 : vector<2x32xf32>
    %cst_75 = arith.constant 1.000000e+00 : f32
    %400 = vector.broadcast %cst_75 : f32 to vector<2x32xf32>
    %401 = arith.addf %400, %399 : vector<2x32xf32>
    %402 = arith.divf %400, %401 : vector<2x32xf32>
    %403 = vector.extract_strided_slice %396 {offsets = [0, 32], sizes = [2, 32], strides = [1, 1]} : vector<2x128xf32> to vector<2x32xf32>
    %404 = arith.negf %403 : vector<2x32xf32>
    %405 = math.exp %404 : vector<2x32xf32>
    %cst_76 = arith.constant 1.000000e+00 : f32
    %406 = vector.broadcast %cst_76 : f32 to vector<2x32xf32>
    %407 = arith.addf %406, %405 : vector<2x32xf32>
    %408 = arith.divf %406, %407 : vector<2x32xf32>
    %409 = vector.extract_strided_slice %396 {offsets = [0, 64], sizes = [2, 32], strides = [1, 1]} : vector<2x128xf32> to vector<2x32xf32>
    %410 = math.tanh %409 : vector<2x32xf32>
    %411 = vector.extract_strided_slice %396 {offsets = [0, 96], sizes = [2, 32], strides = [1, 1]} : vector<2x128xf32> to vector<2x32xf32>
    %412 = arith.negf %411 : vector<2x32xf32>
    %413 = math.exp %412 : vector<2x32xf32>
    %cst_77 = arith.constant 1.000000e+00 : f32
    %414 = vector.broadcast %cst_77 : f32 to vector<2x32xf32>
    %415 = arith.addf %414, %413 : vector<2x32xf32>
    %416 = arith.divf %414, %415 : vector<2x32xf32>
    %417 = arith.mulf %408, %391 : vector<2x32xf32>
    %418 = arith.mulf %402, %410 : vector<2x32xf32>
    %419 = arith.addf %417, %418 : vector<2x32xf32>
    %420 = math.tanh %419 : vector<2x32xf32>
    %421 = arith.mulf %416, %420 : vector<2x32xf32>
    %422 = arith.truncf %421 : vector<2x32xf32> to vector<2x32xbf16>
    %cst_78 = arith.constant dense<0.000000e+00> : vector<2x128xf32>
    %423 = tpu.matmul %422, %254, %cst_78 {dimension_numbers = #tpu.dot_dimension_numbers<[1], [0], [0], [1], [0, 0, 1, 1], [], []>} : vector<2x32xbf16>, vector<32x128xbf16>, vector<2x128xf32> -> vector<2x128xf32>
    %424 = arith.addf %273, %423 : vector<2x128xf32>
    %425 = vector.extract_strided_slice %424 {offsets = [0, 0], sizes = [2, 32], strides = [1, 1]} : vector<2x128xf32> to vector<2x32xf32>
    %426 = arith.negf %425 : vector<2x32xf32>
    %427 = math.exp %426 : vector<2x32xf32>
    %cst_79 = arith.constant 1.000000e+00 : f32
    %428 = vector.broadcast %cst_79 : f32 to vector<2x32xf32>
    %429 = arith.addf %428, %427 : vector<2x32xf32>
    %430 = arith.divf %428, %429 : vector<2x32xf32>
    %431 = vector.extract_strided_slice %424 {offsets = [0, 32], sizes = [2, 32], strides = [1, 1]} : vector<2x128xf32> to vector<2x32xf32>
    %432 = arith.negf %431 : vector<2x32xf32>
    %433 = math.exp %432 : vector<2x32xf32>
    %cst_80 = arith.constant 1.000000e+00 : f32
    %434 = vector.broadcast %cst_80 : f32 to vector<2x32xf32>
    %435 = arith.addf %434, %433 : vector<2x32xf32>
    %436 = arith.divf %434, %435 : vector<2x32xf32>
    %437 = vector.extract_strided_slice %424 {offsets = [0, 64], sizes = [2, 32], strides = [1, 1]} : vector<2x128xf32> to vector<2x32xf32>
    %438 = math.tanh %437 : vector<2x32xf32>
    %439 = vector.extract_strided_slice %424 {offsets = [0, 96], sizes = [2, 32], strides = [1, 1]} : vector<2x128xf32> to vector<2x32xf32>
    %440 = arith.negf %439 : vector<2x32xf32>
    %441 = math.exp %440 : vector<2x32xf32>
    %cst_81 = arith.constant 1.000000e+00 : f32
    %442 = vector.broadcast %cst_81 : f32 to vector<2x32xf32>
    %443 = arith.addf %442, %441 : vector<2x32xf32>
    %444 = arith.divf %442, %443 : vector<2x32xf32>
    %445 = arith.mulf %436, %419 : vector<2x32xf32>
    %446 = arith.mulf %430, %438 : vector<2x32xf32>
    %447 = arith.addf %445, %446 : vector<2x32xf32>
    %448 = math.tanh %447 : vector<2x32xf32>
    %449 = arith.mulf %444, %448 : vector<2x32xf32>
    %450 = arith.truncf %449 : vector<2x32xf32> to vector<2x32xbf16>
    %cst_82 = arith.constant dense<0.000000e+00> : vector<2x128xf32>
    %451 = tpu.matmul %450, %254, %cst_82 {dimension_numbers = #tpu.dot_dimension_numbers<[1], [0], [0], [1], [0, 0, 1, 1], [], []>} : vector<2x32xbf16>, vector<32x128xbf16>, vector<2x128xf32> -> vector<2x128xf32>
    %452 = arith.addf %276, %451 : vector<2x128xf32>
    %453 = vector.extract_strided_slice %452 {offsets = [0, 0], sizes = [2, 32], strides = [1, 1]} : vector<2x128xf32> to vector<2x32xf32>
    %454 = arith.negf %453 : vector<2x32xf32>
    %455 = math.exp %454 : vector<2x32xf32>
    %cst_83 = arith.constant 1.000000e+00 : f32
    %456 = vector.broadcast %cst_83 : f32 to vector<2x32xf32>
    %457 = arith.addf %456, %455 : vector<2x32xf32>
    %458 = arith.divf %456, %457 : vector<2x32xf32>
    %459 = vector.extract_strided_slice %452 {offsets = [0, 32], sizes = [2, 32], strides = [1, 1]} : vector<2x128xf32> to vector<2x32xf32>
    %460 = arith.negf %459 : vector<2x32xf32>
    %461 = math.exp %460 : vector<2x32xf32>
    %cst_84 = arith.constant 1.000000e+00 : f32
    %462 = vector.broadcast %cst_84 : f32 to vector<2x32xf32>
    %463 = arith.addf %462, %461 : vector<2x32xf32>
    %464 = arith.divf %462, %463 : vector<2x32xf32>
    %465 = vector.extract_strided_slice %452 {offsets = [0, 64], sizes = [2, 32], strides = [1, 1]} : vector<2x128xf32> to vector<2x32xf32>
    %466 = math.tanh %465 : vector<2x32xf32>
    %467 = vector.extract_strided_slice %452 {offsets = [0, 96], sizes = [2, 32], strides = [1, 1]} : vector<2x128xf32> to vector<2x32xf32>
    %468 = arith.negf %467 : vector<2x32xf32>
    %469 = math.exp %468 : vector<2x32xf32>
    %cst_85 = arith.constant 1.000000e+00 : f32
    %470 = vector.broadcast %cst_85 : f32 to vector<2x32xf32>
    %471 = arith.addf %470, %469 : vector<2x32xf32>
    %472 = arith.divf %470, %471 : vector<2x32xf32>
    %473 = arith.mulf %464, %447 : vector<2x32xf32>
    %474 = arith.mulf %458, %466 : vector<2x32xf32>
    %475 = arith.addf %473, %474 : vector<2x32xf32>
    %476 = math.tanh %475 : vector<2x32xf32>
    %477 = arith.mulf %472, %476 : vector<2x32xf32>
    %478 = arith.truncf %477 : vector<2x32xf32> to vector<2x32xbf16>
    %cst_86 = arith.constant dense<0.000000e+00> : vector<2x128xf32>
    %479 = tpu.matmul %478, %254, %cst_86 {dimension_numbers = #tpu.dot_dimension_numbers<[1], [0], [0], [1], [0, 0, 1, 1], [], []>} : vector<2x32xbf16>, vector<32x128xbf16>, vector<2x128xf32> -> vector<2x128xf32>
    %480 = arith.addf %279, %479 : vector<2x128xf32>
    %481 = vector.extract_strided_slice %480 {offsets = [0, 0], sizes = [2, 32], strides = [1, 1]} : vector<2x128xf32> to vector<2x32xf32>
    %482 = arith.negf %481 : vector<2x32xf32>
    %483 = math.exp %482 : vector<2x32xf32>
    %cst_87 = arith.constant 1.000000e+00 : f32
    %484 = vector.broadcast %cst_87 : f32 to vector<2x32xf32>
    %485 = arith.addf %484, %483 : vector<2x32xf32>
    %486 = arith.divf %484, %485 : vector<2x32xf32>
    %487 = vector.extract_strided_slice %480 {offsets = [0, 32], sizes = [2, 32], strides = [1, 1]} : vector<2x128xf32> to vector<2x32xf32>
    %488 = arith.negf %487 : vector<2x32xf32>
    %489 = math.exp %488 : vector<2x32xf32>
    %cst_88 = arith.constant 1.000000e+00 : f32
    %490 = vector.broadcast %cst_88 : f32 to vector<2x32xf32>
    %491 = arith.addf %490, %489 : vector<2x32xf32>
    %492 = arith.divf %490, %491 : vector<2x32xf32>
    %493 = vector.extract_strided_slice %480 {offsets = [0, 64], sizes = [2, 32], strides = [1, 1]} : vector<2x128xf32> to vector<2x32xf32>
    %494 = math.tanh %493 : vector<2x32xf32>
    %495 = vector.extract_strided_slice %480 {offsets = [0, 96], sizes = [2, 32], strides = [1, 1]} : vector<2x128xf32> to vector<2x32xf32>
    %496 = arith.negf %495 : vector<2x32xf32>
    %497 = math.exp %496 : vector<2x32xf32>
    %cst_89 = arith.constant 1.000000e+00 : f32
    %498 = vector.broadcast %cst_89 : f32 to vector<2x32xf32>
    %499 = arith.addf %498, %497 : vector<2x32xf32>
    %500 = arith.divf %498, %499 : vector<2x32xf32>
    %501 = arith.mulf %492, %475 : vector<2x32xf32>
    %502 = arith.mulf %486, %494 : vector<2x32xf32>
    %503 = arith.addf %501, %502 : vector<2x32xf32>
    %504 = math.tanh %503 : vector<2x32xf32>
    %505 = arith.mulf %500, %504 : vector<2x32xf32>
    %506 = arith.truncf %505 : vector<2x32xf32> to vector<2x32xbf16>
    %c0_90 = arith.constant 0 : index
    %c0_91 = arith.constant 0 : index
    %507 = vector.load %arg7[%c0_90, %c0_91] : memref<32x32xbf16, #tpu.memory_space<vmem>>, vector<32x32xbf16>
    %cst_92 = arith.constant dense<0.000000e+00> : vector<2x32xf32>
    %508 = tpu.matmul %506, %507, %cst_92 {dimension_numbers = #tpu.dot_dimension_numbers<[1], [0], [0], [1], [0, 0, 1, 1], [], []>} : vector<2x32xbf16>, vector<32x32xbf16>, vector<2x32xf32> -> vector<2x32xf32>
    %c0_93 = arith.constant 0 : index
    %c0_94 = arith.constant 0 : index
    %509 = vector.load %arg8[%c0_93, %c0_94] : memref<1x32xf32, #tpu.memory_space<vmem>>, vector<1x32xf32>
    %510 = vector.broadcast %509 : vector<1x32xf32> to vector<2x32xf32>
    %511 = arith.addf %508, %510 : vector<2x32xf32>
    %512 = arith.truncf %511 : vector<2x32xf32> to vector<2x32xbf16>
    %c0_95 = arith.constant 0 : index
    %c0_96 = arith.constant 0 : index
    %513 = vector.load %arg9[%c0_95, %c0_96] : memref<32x8xbf16, #tpu.memory_space<vmem>>, vector<32x8xbf16>
    %cst_97 = arith.constant dense<0.000000e+00> : vector<2x8xf32>
    %514 = tpu.matmul %512, %513, %cst_97 {dimension_numbers = #tpu.dot_dimension_numbers<[1], [0], [0], [1], [0, 0, 1, 1], [], []>} : vector<2x32xbf16>, vector<32x8xbf16>, vector<2x8xf32> -> vector<2x8xf32>
    %c0_98 = arith.constant 0 : index
    %c0_99 = arith.constant 0 : index
    %515 = vector.load %arg10[%c0_98, %c0_99] : memref<1x8xf32, #tpu.memory_space<vmem>>, vector<1x8xf32>
    %516 = vector.broadcast %515 : vector<1x8xf32> to vector<2x8xf32>
    %517 = arith.addf %514, %516 : vector<2x8xf32>
    %c0_100 = arith.constant 0 : index
    %c0_101 = arith.constant 0 : index
    %518 = vector.load %arg11[%c0_100, %c0_101] : memref<2x8xf32, #tpu.memory_space<vmem>>, vector<2x8xf32>
    tpu.vector_store %arg11[%c0_100, %c0_101], %517 {strides = array<i32>} : memref<2x8xf32, #tpu.memory_space<vmem>>, vector<2x8xf32>,
    return
  }
}

</mosaic_0001>

<bundles_post_ra>
// kernel: lstm_net_forward.1
= control target key start
LH: loop header
LB: loop body
LE: loop exit
PB: predicated region body
PF: predicated region fallthrough
CT: control target
= control target key end

     0   :  { %16 = vsyncpa [#allocation3], 0  ;;  %s2663_s0 = inlined_call_operand.vmem [shape: f32[2,8,16], index: 0, kind: input, shape index: {}]   ;;  %s2664_s1 = inlined_call_operand.hbm [shape: bf16[16,128], index: 1, kind: input, shape index: {}]   ;;  %s2665_s2 = inlined_call_operand.hbm [shape: bf16[32,128], index: 2, kind: input, shape index: {}]   ;;  %s2666_s3 = inlined_call_operand.vmem [shape: f32[1,128], index: 3, kind: input, shape index: {}]   ;;  %s2667_s4 = inlined_call_operand.hbm [shape: bf16[32,128], index: 4, kind: input, shape index: {}]   ;;  %s2668_s5 = inlined_call_operand.hbm [shape: bf16[32,128], index: 5, kind: input, shape index: {}]   ;;  %s2669_s6 = inlined_call_operand.vmem [shape: f32[1,128], index: 6, kind: input, shape index: {}]   ;;  %s2670_s7 = inlined_call_operand.hbm [shape: bf16[32,32], index: 7, kind: input, shape index: {}]   ;;  %s2671_s8 = inlined_call_operand.vmem [shape: f32[1,32], index: 8, kind: input, shape index: {}]   ;;  %s2672_s9 = inlined_call_operand.vmem [shape: bf16[32,8], index: 9, kind: input, shape index: {}]   ;;  %s2673_s10 = inlined_call_operand.vmem [shape: f32[1,8], index: 10, kind: input, shape index: {}]   ;;  %s2674_s11 = inlined_call_operand.hbm [shape: f32[2,8], index: 11, kind: output, shape index: {}]  }
   0x1   :  { %17 = vsyncpa [#allocation6], 0 }
   0x2   :  { %18 = vsyncpa [#allocation9], 0 }
   0x3   :  { %19 = vsyncpa [#allocation4], 0  ;;  %s39_s19 = sshll.u32 %s2665_s2, 4  ;;  %s2240_s20 = smov [#allocation5]   ;;  %s40_s19 = int_to_ptr.hbm [resolvable:$true] %s39_s19 }
   0x4   :  { %s41_s21 = sshll.u32 %s2240_s20, 4  ;;  %s67_s24 = sshll.u32 %s2668_s5, 4  ;;  %s42_s21 = int_to_ptr.vmem [resolvable:$true] %s41_s21  ;;  %s68_s24 = int_to_ptr.hbm [resolvable:$true] %s67_s24 }
   0x5   :  { %s2241_s25 = smov 64   ;;  %s2242_s26 = smov 4  }
   0x6   :  { %47 = dma.hbm_to_vmem [thread:$0]  %s40_s19, 256, %s42_s21, [#allocation6], %s2241_s25, %s2241_s25, %s2242_s26  }
   0x7   :  { %s2243_s27 = smov [#allocation8]   ;;  %s26_s2 = sshll.u32 %s2664_s1, 4  ;;  %s27_s2 = int_to_ptr.hbm [resolvable:$true] %s26_s2 }
   0x8   :  { %s69_s28 = sshll.u32 %s2243_s27, 4  ;;  %s54_s5 = sshll.u32 %s2667_s4, 4  ;;  %s70_s28 = int_to_ptr.vmem [resolvable:$true] %s69_s28  ;;  %s55_s5 = int_to_ptr.hbm [resolvable:$true] %s54_s5 }
   0x9   :  { %75 = dma.hbm_to_vmem [thread:$0]  %s68_s24, 256, %s70_s28, [#allocation9], %s2241_s25, %s2241_s25, %s2242_s26  }
   0xa   :  { %s2244_s14 = smov [#allocation2]   ;;  %s2245_s16 = smov [#allocation7]  }
   0xb   :  { %s28_s15 = sshll.u32 %s2244_s14, 4  ;;  %s56_s17 = sshll.u32 %s2245_s16, 4  ;;  %s29_s15 = int_to_ptr.vmem [resolvable:$true] %s28_s15  ;;  %s57_s17 = int_to_ptr.vmem [resolvable:$true] %s56_s17 }
   0xc   :  { %34 = dma.hbm_to_vmem [thread:$0]  %s27_s2, 128, %s29_s15, [#allocation3], %s2241_s25, %s2241_s25, %s2242_s26  }
   0xd   :  { %s82_s19 = sshll.u32 %s2670_s7, 4  ;;  %s2246_s20 = smov [#allocation10]   ;;  %s83_s19 = int_to_ptr.hbm [resolvable:$true] %s82_s19 }
   0xe   :  { %62 = dma.hbm_to_vmem [thread:$0]  %s55_s5, 256, %s57_s17, [#allocation6], %s2241_s25, %s2241_s25, %s2242_s26  }
   0xf   :  { %s84_s4 = sshll.u32 %s2246_s20, 4  ;;  %s85_s4 = int_to_ptr.vmem [resolvable:$true] %s84_s4 }
  0x10   :  { %90 = dma.hbm_to_vmem [thread:$0]  %s83_s19, 256, %s85_s4, [#allocation9], %s2241_s25, %s2241_s25, %s2242_s26  }
  0x11   :  { %2232 = dma.done.wait [#allocation3], 128  }
  0x12   :  { %2233 = vsyncadd [#allocation3], 4294967168 }
  0x13   :  { %2234 = dma.done.wait [#allocation6], 512  }
  0x14   :  { %2235 = vsyncadd [#allocation6], 4294966784 }
  0x15   :  { %2236 = dma.done.wait [#allocation9], 512  }
  0x16   :  { %2237 = vsyncadd [#allocation9], 4294966784  ;;  %v1870_v0 = vld [vmem:[#allocation2] sm:$0xff]  ;;  %v1872_v1 = vld [vmem:[#allocation5 + $0x8] sm:$0xff]  ;;  %vm137_vm0 = vcmask 130048   ;;  %v2247_v6 = vmov 0  }
  0x17   :  { %v118_v2 = vld [vmem:[%s2663_s0] sm:$0xff]  ;;  %v119_v3 = vld [vmem:[%s2663_s0 + $0x8] sm:$0xff]  ;;  %148 = vmatpush.bf16.msra.mxu0 %v1870_v0  ;;  %177 = vmatpush.bf16.msra.mxu1 %v1872_v1  ;;  %vm271_vm9 = vcmask 1041409   ;;  %vm167_vm10 = vcmask 261120   ;;  %s2249_s15 = smov [#allocation11]   ;;  %s1765_s18 = sshll.u32 %s2674_s11, 4  ;;  %s1766_s18 = int_to_ptr.hbm [resolvable:$true] %s1765_s18 }
  0x18   :  { %v120_v4 = vpack.c.bf16 %v119_v3, %v118_v2  ;;  %v1871_v5 = vld [vmem:[#allocation5] sm:$0xff]  ;;  %285 = vmatpush.bf16.msra.mxu2 %v1872_v1  ;;  %398 = vmatpush.bf16.msra.mxu3 %v1872_v1  ;;  %v1891_v9 = vld [vmem:[%s2666_s3] ss:$0 sm:$0xff]  ;;  %s2248_s3 = smov 32  }
  0x1a   :  { %1781 = vmatmul.msk.bf16.vlgmr.msra.gmra.mxu0 %vm137_vm0, %v120_v4 }
  0x1b   :  { %513 = vmatpush.bf16.msrb.mxu0 %v1872_v1  ;;  %178 = vmatpush.bf16.msra.mxu1 %v1871_v5 }
  0x1c   :  { %286 = vmatpush.bf16.msra.mxu2 %v1871_v5  ;;  %399 = vmatpush.bf16.msra.mxu3 %v1871_v5 }
  0x1e   :  { %179 = vmatmul.bf16.vlgmr.msra.gmra.mxu1 %v2247_v6 }
  0x1f   :  { %514 = vmatpush.bf16.msrb.mxu0 %v1871_v5  ;;  %628 = vmatpush.bf16.msrb.mxu1 %v1872_v1 }
  0x20   :  { %743 = vmatpush.bf16.msrb.mxu2 %v1872_v1  ;;  %858 = vmatpush.bf16.msrb.mxu3 %v1872_v1 }
  0x23   :  { %973 = vmatpush.bf16.msra.mxu0 %v1872_v1  ;;  %629 = vmatpush.bf16.msrb.mxu1 %v1871_v5 }
  0x24   :  { %744 = vmatpush.bf16.msrb.mxu2 %v1871_v5  ;;  %859 = vmatpush.bf16.msrb.mxu3 %v1871_v5 }
  0x27   :  { %974 = vmatpush.bf16.msra.mxu0 %v1871_v5 }
  0x97   :  { %v150_v7 = vpop.f32.mrf.mxu0 }
  0x98   :  { %v2348_v15 = vadd.f32 %v1891_v9, %v150_v7 }
  0x9b   :  { %v180_v8 = vpop.f32.mrf.mxu1 }
  0x9c   :  { %v185_v10 = vrot.slane %v180_v8, 1  ;;  %v188_v16 = vadd.f32 %v180_v8, %v2348_v15 }
  0x9e   :  { %v1790_v20 = vmul.f32 -1.442695, %v188_v16 }
  0x9f   :  { %v152_v11 = vpop.f32.mrf.mxu0 }
  0xa0   :  { %v2345_v12 = vadd.f32 %v1891_v9, %v152_v11 }
  0xa2   :  { %v189_v13 = vadd.f32 %v185_v10, %v2345_v12 }
  0xa3   :  { %v182_v14 = vpop.f32.mrf.mxu1 }
  0xa4   :  { %1895 = vtanh.f32 %v189_v13  ;;  %v1791_v19 = vmul.f32 -1.442695, %v189_v13 }
  0xa5   :  { %1897 = vtanh.f32 %v188_v16 }
  0xa6   :  { %1899 = vpow2.f32 %v1791_v19 }
  0xa7   :  { %1901 = vpow2.f32 %v1790_v20 }
  0xaa   :  { %v1896_v17 = vpop.eup %1895 }
  0xab   :  { %236 = vrot.lane.b32.xlu0 %v1896_v17, %s2241_s25  ;;  %v1898_v18 = vpop.eup %1897 }
  0xac   :  { %v1900_v21 = vpop.eup %1899 }
  0xad   :  { %v197_v22 = vadd.f32 1.0, %v1900_v21  ;;  %v1902_v23 = vpop.eup %1901 }
  0xae   :  { %v196_v24 = vadd.f32 1.0, %v1902_v23 }
  0xaf   :  { %1903 = vrcp.f32 %v197_v22  ;;  %v224_v33 = vand.u32 2147483648, %v197_v22  ;;  %vm218_vm2 = vweird.f32 %v197_v22  ;;  %v222_v34 = vand.u32 2147483647, %v197_v22 }
  0xb0   :  { %1905 = vrcp.f32 %v196_v24  ;;  %v209_v42 = vand.u32 2147483648, %v196_v24  ;;  %vm203_vm6 = vweird.f32 %v196_v24  ;;  %v207_v43 = vand.u32 2147483647, %v196_v24 }
  0xb1   :  { %v225_v37 = vor.u32 1.1754944e-38, %v224_v33  ;;  %vm223_vm4 = vcmp.eq.f32.partialorder %v222_v34, 8.507059e+37 }
  0xb2   :  { %v210_v45 = vor.u32 1.1754944e-38, %v209_v42  ;;  %vm208_vm8 = vcmp.eq.f32.partialorder %v207_v43, 8.507059e+37 }
  0xb3   :  { %234 = vrot.lane.b32.xlu0 %v1898_v18, %s2241_s25 }
  0xb5   :  { %v1904_v25 = vpop.eup %1903 }
  0xb6   :  { %v214_v26 = vmul.f32 %v1904_v25, %v197_v22  ;;  %v1906_v28 = vpop.eup %1905  ;;  %vm219_vm1 = vweird.f32 %v1904_v25 }
  0xb7   :  { %v199_v30 = vmul.f32 %v1906_v28, %v196_v24  ;;  %vm220_vm3 = vmor %vm218_vm2, %vm219_vm1  ;;  %vm204_vm5 = vweird.f32 %v1906_v28 }
  0xb8   :  { %v215_v27 = vsub.f32 1.0, %v214_v26  ;;  %vm205_vm7 = vmor %vm203_vm6, %vm204_vm5 }
  0xb9   :  { %v200_v32 = vsub.f32 1.0, %v199_v30 }
  0xba   :  { %v216_v29 = vmul.f32 %v1904_v25, %v215_v27 }
  0xbb   :  { %v201_v36 = vmul.f32 %v1906_v28, %v200_v32 }
  0xbc   :  { %v217_v31 = vadd.f32 %v1904_v25, %v216_v29 }
  0xbd   :  { %v202_v41 = vadd.f32 %v1906_v28, %v201_v36 }
  0xbe   :  { %v221_v35 = vsel %vm220_vm3, %v1904_v25, %v217_v31 }
  0xbf   :  { %v226_v39 = vsel %vm223_vm4, %v225_v37, %v221_v35  ;;  %v206_v44 = vsel %vm205_vm7, %v1906_v28, %v202_v41 }
  0xc0   :  { %v211_v47 = vsel %vm208_vm8, %v210_v45, %v206_v44  ;;  %v231_v49 = vmul.f32 0.0, %v226_v39 }
  0xc1   :  { %v230_v52 = vmul.f32 0.0, %v211_v47 }
 0x11d   :  { %v237_v38 = vpop.permute.xlu0 %236 }
 0x11e   :  { %v241_v40 = vmul.f32 %v237_v38, %v226_v39 }
 0x120   :  { %246 = vrot.lane.b32.xlu1 %v241_v40, %s2248_s3 }
 0x125   :  { %v235_v46 = vpop.permute.xlu0 %234 }
 0x126   :  { %v240_v48 = vmul.f32 %v235_v46, %v211_v47 }
 0x128   :  { %244 = vrot.lane.b32.xlu1 %v240_v48, %s2248_s3 }
 0x192   :  { %v247_v50 = vpop.permute.xlu1 %246 }
 0x193   :  { %v2355_v51 = vadd.f32 %v247_v50, %v231_v49 }
 0x195   :  { %1907 = vtanh.f32 %v2355_v51  ;;  %v341_v45 = vrot.slane %v2355_v51, 7 }
 0x19a   :  { %v245_v53 = vpop.permute.xlu1 %244 }
 0x19b   :  { %v1908_v54 = vpop.eup %1907  ;;  %v2358_v55 = vadd.f32 %v245_v53, %v230_v52 }
 0x19c   :  { %258 = vrot.lane.b32.xlu2 %v1908_v54, %s2241_s25 }
 0x19d   :  { %1909 = vtanh.f32 %v2358_v55  ;;  %v340_v50 = vrot.slane %v2358_v55, 7 }
 0x1a3   :  { %v1910_v56 = vpop.eup %1909 }
 0x1a4   :  { %256 = vrot.lane.b32.xlu2 %v1910_v56, %s2241_s25 }
 0x1f6   :  { %v259_v57 = vpop.permute.xlu2 %258 }
 0x1f7   :  { %v263_v58 = vmul.f32 %v259_v57, %v226_v39 }
 0x1f9   :  { %v265_v59 = vpack.c.bf16 %v263_v58, %v263_v58 }
 0x1fb   :  { %v269_v61 = vunpack.c.l.b16 %v265_v59 }
 0x1fd   :  { %v270_v0 = vrot.slane %v269_v61, 7 }
 0x1fe   :  { %v257_v60 = vpop.permute.xlu2 %256 }
 0x1ff   :  { %v262_v62 = vmul.f32 %v257_v60, %v211_v47 }
 0x201   :  { %v264_v63 = vpack.c.bf16 %v262_v62, %v262_v62 }
 0x203   :  { %v268_v1 = vunpack.c.l.b16 %v264_v63 }
 0x205   :  { %v272_v2 = vsel %vm271_vm9, %v270_v0, %v268_v1 }
 0x206   :  { %v273_v3 = vpack.c.b16 %v272_v2, %v272_v2 }
 0x208   :  { %274 = vrot.lane.b32.xlu0 %v273_v3, %s2248_s3 }
 0x27a   :  { %v2365_v4 = vpop.permute.xlu0 %274 }
 0x27b   :  { %1792 = vmatmul.msk.bf16.vlgmr.msra.gmra.mxu2 %vm167_vm10, %v2365_v4 }
 0x2fe   :  { %v288_v5 = vpop.f32.mrf.mxu2 }
 0x2ff   :  { %v293_v7 = vrot.slane %v288_v5, 7  ;;  %v297_v8 = vadd.f32 %v288_v5, %v2345_v12 }
 0x301   :  { %v296_v9 = vadd.f32 %v293_v7, %v2348_v15  ;;  %1911 = vtanh.f32 %v297_v8  ;;  %v1794_v14 = vmul.f32 -1.442695, %v297_v8 }
 0x303   :  { %1913 = vtanh.f32 %v296_v9  ;;  %v1793_v20 = vmul.f32 -1.442695, %v296_v9 }
 0x304   :  { %1915 = vpow2.f32 %v1794_v14 }
 0x306   :  { %v290_v10 = vpop.f32.mrf.mxu2 }
 0x307   :  { %v1912_v11 = vpop.eup %1911 }
 0x308   :  { %350 = vrot.lane.b32.xlu2 %v1912_v11, %s2241_s25 }
 0x309   :  { %v1914_v13 = vpop.eup %1913 }
 0x30a   :  { %348 = vrot.lane.b32.xlu1 %v1914_v13, %s2241_s25  ;;  %v1916_v16 = vpop.eup %1915 }
 0x30b   :  { %v305_v17 = vadd.f32 1.0, %v1916_v16 }
 0x30d   :  { %1917 = vrcp.f32 %v305_v17  ;;  %v332_v25 = vand.u32 2147483648, %v305_v17  ;;  %vm326_vm12 = vweird.f32 %v305_v17  ;;  %v330_v27 = vand.u32 2147483647, %v305_v17 }
 0x30e   :  { %1919 = vpow2.f32 %v1793_v20 }
 0x30f   :  { %v333_v29 = vor.u32 1.1754944e-38, %v332_v25  ;;  %vm331_vm14 = vcmp.eq.f32.partialorder %v330_v27, 8.507059e+37 }
 0x313   :  { %v1918_v18 = vpop.eup %1917 }
 0x314   :  { %v322_v19 = vmul.f32 %v1918_v18, %v305_v17  ;;  %v1920_v23 = vpop.eup %1919  ;;  %vm327_vm11 = vweird.f32 %v1918_v18 }
 0x315   :  { %v304_v26 = vadd.f32 1.0, %v1920_v23  ;;  %vm328_vm13 = vmor %vm326_vm12, %vm327_vm11 }
 0x316   :  { %v323_v21 = vsub.f32 1.0, %v322_v19 }
 0x317   :  { %1921 = vrcp.f32 %v304_v26  ;;  %v317_v38 = vand.u32 2147483648, %v304_v26  ;;  %vm311_vm0 = vweird.f32 %v304_v26  ;;  %v315_v39 = vand.u32 2147483647, %v304_v26 }
 0x318   :  { %v324_v22 = vmul.f32 %v1918_v18, %v323_v21 }
 0x319   :  { %v318_v41 = vor.u32 1.1754944e-38, %v317_v38  ;;  %vm316_vm2 = vcmp.eq.f32.partialorder %v315_v39, 8.507059e+37 }
 0x31a   :  { %v325_v24 = vadd.f32 %v1918_v18, %v324_v22 }
 0x31c   :  { %v329_v28 = vsel %vm328_vm13, %v1918_v18, %v325_v24 }
 0x31d   :  { %v334_v31 = vsel %vm331_vm14, %v333_v29, %v329_v28  ;;  %v1922_v33 = vpop.eup %1921 }
 0x31e   :  { %v307_v34 = vmul.f32 %v1922_v33, %v304_v26  ;;  %vm312_vm15 = vweird.f32 %v1922_v33  ;;  %v345_v46 = vmul.f32 %v341_v45, %v334_v31 }
 0x31f   :  { %vm313_vm1 = vmor %vm311_vm0, %vm312_vm15 }
 0x320   :  { %v308_v35 = vsub.f32 1.0, %v307_v34 }
 0x322   :  { %v309_v36 = vmul.f32 %v1922_v33, %v308_v35 }
 0x324   :  { %v310_v37 = vadd.f32 %v1922_v33, %v309_v36 }
 0x326   :  { %v314_v40 = vsel %vm313_vm1, %v1922_v33, %v310_v37 }
 0x327   :  { %v319_v43 = vsel %vm316_vm2, %v318_v41, %v314_v40 }
 0x328   :  { %v344_v52 = vmul.f32 %v340_v50, %v319_v43 }
 0x362   :  { %v351_v30 = vpop.permute.xlu2 %350 }
 0x363   :  { %v355_v32 = vmul.f32 %v351_v30, %v334_v31 }
 0x365   :  { %360 = vrot.lane.b32.xlu1 %v355_v32, %s2248_s3 }
 0x37c   :  { %v349_v42 = vpop.permute.xlu1 %348 }
 0x37d   :  { %v354_v44 = vmul.f32 %v349_v42, %v319_v43 }
 0x37f   :  { %358 = vrot.lane.b32.xlu0 %v354_v44, %s2248_s3 }
 0x3d7   :  { %v361_v47 = vpop.permute.xlu1 %360 }
 0x3d8   :  { %v2376_v48 = vadd.f32 %v361_v47, %v345_v46 }
 0x3da   :  { %1923 = vtanh.f32 %v2376_v48  ;;  %v455_v46 = vrot.slane %v2376_v48, 7 }
 0x3e0   :  { %v1924_v49 = vpop.eup %1923 }
 0x3e1   :  { %372 = vrot.lane.b32.xlu0 %v1924_v49, %s2241_s25 }
 0x3f1   :  { %v359_v53 = vpop.permute.xlu0 %358 }
 0x3f2   :  { %v2381_v54 = vadd.f32 %v359_v53, %v344_v52 }
 0x3f4   :  { %1925 = vtanh.f32 %v2381_v54  ;;  %v454_v45 = vrot.slane %v2381_v54, 7 }
 0x3fa   :  { %v1926_v56 = vpop.eup %1925 }
 0x3fb   :  { %370 = vrot.lane.b32.xlu2 %v1926_v56, %s2241_s25 }
 0x453   :  { %v373_v51 = vpop.permute.xlu0 %372 }
 0x454   :  { %v377_v57 = vmul.f32 %v373_v51, %v334_v31 }
 0x455   :  { %v371_v58 = vpop.permute.xlu2 %370 }
 0x456   :  { %v376_v59 = vmul.f32 %v371_v58, %v319_v43  ;;  %v379_v60 = vpack.c.bf16 %v377_v57, %v377_v57 }
 0x458   :  { %v378_v61 = vpack.c.bf16 %v376_v59, %v376_v59  ;;  %v383_v63 = vunpack.c.l.b16 %v379_v60 }
 0x45a   :  { %v382_v62 = vunpack.c.l.b16 %v378_v61 }
 0x45c   :  { %v384_v0 = vrot.slane %v382_v62, 1 }
 0x45e   :  { %v385_v55 = vsel %vm271_vm9, %v383_v63, %v384_v0 }
 0x45f   :  { %v386_v1 = vpack.c.b16 %v385_v55, %v385_v55 }
 0x461   :  { %387 = vrot.lane.b32.xlu1 %v386_v1, %s2248_s3 }
 0x4d3   :  { %v2387_v2 = vpop.permute.xlu1 %387 }
 0x4d4   :  { %1795 = vmatmul.msk.bf16.vlgmr.msra.gmra.mxu3 %vm167_vm10, %v2387_v2 }
 0x557   :  { %v401_v3 = vpop.f32.mrf.mxu3 }
 0x558   :  { %v406_v5 = vrot.slane %v401_v3, 6  ;;  %v407_v7 = vrot.slane %v401_v3, 7 }
 0x55a   :  { %v410_v8 = vadd.f32 %v406_v5, %v2348_v15  ;;  %v411_v9 = vadd.f32 %v407_v7, %v2345_v12 }
 0x55c   :  { %1927 = vtanh.f32 %v410_v8  ;;  %v1796_v14 = vmul.f32 -1.442695, %v410_v8  ;;  %v1797_v19 = vmul.f32 -1.442695, %v411_v9 }
 0x55d   :  { %1929 = vtanh.f32 %v411_v9 }
 0x55e   :  { %1931 = vpow2.f32 %v1796_v14 }
 0x55f   :  { %v403_v10 = vpop.f32.mrf.mxu3 }
 0x562   :  { %v1928_v11 = vpop.eup %1927 }
 0x563   :  { %v1930_v13 = vpop.eup %1929  ;;  %462 = vrot.lane.b32.xlu2 %v1928_v11, %s2241_s25 }
 0x564   :  { %464 = vrot.lane.b32.xlu0 %v1930_v13, %s2241_s25  ;;  %v1932_v16 = vpop.eup %1931 }
 0x565   :  { %v418_v17 = vadd.f32 1.0, %v1932_v16 }
 0x567   :  { %1933 = vrcp.f32 %v418_v17  ;;  %v431_v26 = vand.u32 2147483648, %v418_v17  ;;  %vm425_vm4 = vweird.f32 %v418_v17  ;;  %v429_v27 = vand.u32 2147483647, %v418_v17 }
 0x568   :  { %1935 = vpow2.f32 %v1797_v19 }
 0x569   :  { %v432_v29 = vor.u32 1.1754944e-38, %v431_v26  ;;  %vm430_vm6 = vcmp.eq.f32.partialorder %v429_v27, 8.507059e+37 }
 0x56d   :  { %v1934_v18 = vpop.eup %1933 }
 0x56e   :  { %v421_v20 = vmul.f32 %v1934_v18, %v418_v17  ;;  %v1936_v23 = vpop.eup %1935  ;;  %vm426_vm3 = vweird.f32 %v1934_v18 }
 0x56f   :  { %v419_v24 = vadd.f32 1.0, %v1936_v23  ;;  %vm427_vm5 = vmor %vm425_vm4, %vm426_vm3 }
 0x570   :  { %v422_v21 = vsub.f32 1.0, %v421_v20 }
 0x571   :  { %1937 = vrcp.f32 %v419_v24  ;;  %v446_v38 = vand.u32 2147483648, %v419_v24  ;;  %vm440_vm8 = vweird.f32 %v419_v24  ;;  %v444_v39 = vand.u32 2147483647, %v419_v24 }
 0x572   :  { %v423_v22 = vmul.f32 %v1934_v18, %v422_v21 }
 0x573   :  { %v447_v41 = vor.u32 1.1754944e-38, %v446_v38  ;;  %vm445_vm12 = vcmp.eq.f32.partialorder %v444_v39, 8.507059e+37 }
 0x574   :  { %v424_v25 = vadd.f32 %v1934_v18, %v423_v22 }
 0x576   :  { %v428_v28 = vsel %vm427_vm5, %v1934_v18, %v424_v25 }
 0x577   :  { %v433_v31 = vsel %vm430_vm6, %v432_v29, %v428_v28  ;;  %v1938_v33 = vpop.eup %1937 }
 0x578   :  { %v436_v34 = vmul.f32 %v1938_v33, %v419_v24  ;;  %vm441_vm7 = vweird.f32 %v1938_v33  ;;  %v458_v47 = vmul.f32 %v454_v45, %v433_v31 }
 0x579   :  { %vm442_vm11 = vmor %vm440_vm8, %vm441_vm7 }
 0x57a   :  { %v437_v35 = vsub.f32 1.0, %v436_v34 }
 0x57c   :  { %v438_v36 = vmul.f32 %v1938_v33, %v437_v35 }
 0x57e   :  { %v439_v37 = vadd.f32 %v1938_v33, %v438_v36 }
 0x580   :  { %v443_v40 = vsel %vm442_vm11, %v1938_v33, %v439_v37 }
 0x581   :  { %v448_v43 = vsel %vm445_vm12, %v447_v41, %v443_v40 }
 0x582   :  { %v459_v49 = vmul.f32 %v455_v46, %v448_v43 }
 0x5bd   :  { %v463_v30 = vpop.permute.xlu2 %462 }
 0x5be   :  { %v468_v32 = vmul.f32 %v463_v30, %v433_v31 }
 0x5c0   :  { %472 = vrot.lane.b32.xlu1 %v468_v32, %s2248_s3 }
 0x5d6   :  { %v465_v42 = vpop.permute.xlu0 %464 }
 0x5d7   :  { %v469_v44 = vmul.f32 %v465_v42, %v448_v43 }
 0x5d9   :  { %474 = vrot.lane.b32.xlu2 %v469_v44, %s2248_s3 }
 0x632   :  { %v473_v50 = vpop.permute.xlu1 %472 }
 0x633   :  { %v475_v52 = vpop.permute.xlu2 %474  ;;  %v2399_v53 = vadd.f32 %v473_v50, %v458_v47 }
 0x634   :  { %v2401_v56 = vadd.f32 %v475_v52, %v459_v49 }
 0x635   :  { %1939 = vtanh.f32 %v2399_v53  ;;  %v569_v47 = vrot.slane %v2399_v53, 7 }
 0x636   :  { %1941 = vtanh.f32 %v2401_v56 }
 0x63b   :  { %v1940_v51 = vpop.eup %1939 }
 0x63c   :  { %v1942_v57 = vpop.eup %1941  ;;  %484 = vrot.lane.b32.xlu0 %v1940_v51, %s2241_s25 }
 0x63d   :  { %486 = vrot.lane.b32.xlu1 %v1942_v57, %s2241_s25  ;;  %v570_v57 = vrot.slane %v2401_v56, 7 }
 0x6ae   :  { %v485_v54 = vpop.permute.xlu0 %484 }
 0x6af   :  { %v487_v48 = vpop.permute.xlu1 %486  ;;  %v490_v58 = vmul.f32 %v485_v54, %v433_v31 }
 0x6b0   :  { %v491_v59 = vmul.f32 %v487_v48, %v448_v43 }
 0x6b1   :  { %v492_v60 = vpack.c.bf16 %v490_v58, %v490_v58 }
 0x6b2   :  { %v493_v61 = vpack.c.bf16 %v491_v59, %v491_v59 }
 0x6b3   :  { %v496_v62 = vunpack.c.l.b16 %v492_v60 }
 0x6b4   :  { %v497_v63 = vunpack.c.l.b16 %v493_v61 }
 0x6b5   :  { %v498_v0 = vrot.slane %v496_v62, 2 }
 0x6b6   :  { %v499_v55 = vrot.slane %v497_v63, 1 }
 0x6b8   :  { %v500_v1 = vsel %vm271_vm9, %v499_v55, %v498_v0 }
 0x6b9   :  { %v501_v3 = vpack.c.b16 %v500_v1, %v500_v1 }
 0x6bb   :  { %502 = vrot.lane.b32.xlu2 %v501_v3, %s2248_s3 }
 0x715   :  { %v2409_v5 = vpop.permute.xlu2 %502 }
 0x716   :  { %1798 = vmatmul.msk.bf16.vlgmr.msrb.gmra.mxu0 %vm167_vm10, %v2409_v5 }
 0x793   :  { %v516_v7 = vpop.f32.mrf.mxu0 }
 0x794   :  { %v521_v8 = vrot.slane %v516_v7, 5  ;;  %v522_v9 = vrot.slane %v516_v7, 6 }
 0x796   :  { %v525_v10 = vadd.f32 %v521_v8, %v2348_v15  ;;  %v526_v11 = vadd.f32 %v522_v9, %v2345_v12  ;;  %v2431_v9 = vld [vmem:[#allocation7 + $0x8] sm:$0xff] }
 0x797   :  { %1099 = vmatpush.bf16.msra.mxu1 %v2431_v9  ;;  %1112 = vmatpush.bf16.msra.mxu2 %v2431_v9 }
 0x798   :  { %1943 = vtanh.f32 %v525_v10  ;;  %v1799_v17 = vmul.f32 -1.442695, %v525_v10  ;;  %v1800_v18 = vmul.f32 -1.442695, %v526_v11  ;;  %v2434_v10 = vld [vmem:[#allocation7] sm:$0xff]  ;;  %1125 = vmatpush.bf16.msra.mxu3 %v2431_v9  ;;  %1138 = vmatpush.bf16.msrb.mxu0 %v2431_v9 }
 0x799   :  { %1945 = vtanh.f32 %v526_v11 }
 0x79a   :  { %1947 = vpow2.f32 %v1799_v17 }
 0x79b   :  { %v518_v13 = vpop.f32.mrf.mxu0  ;;  %1949 = vpow2.f32 %v1800_v18  ;;  %1100 = vmatpush.bf16.msra.mxu1 %v2434_v10  ;;  %1113 = vmatpush.bf16.msra.mxu2 %v2434_v10 }
 0x79c   :  { %1126 = vmatpush.bf16.msra.mxu3 %v2434_v10  ;;  %1139 = vmatpush.bf16.msrb.mxu0 %v2434_v10 }
 0x79e   :  { %v1944_v14 = vpop.eup %1943 }
 0x79f   :  { %v1946_v16 = vpop.eup %1945  ;;  %577 = vrot.lane.b32.xlu0 %v1944_v14, %s2241_s25 }
 0x7a0   :  { %579 = vrot.lane.b32.xlu1 %v1946_v16, %s2241_s25  ;;  %v1948_v19 = vpop.eup %1947 }
 0x7a1   :  { %v1950_v20 = vpop.eup %1949  ;;  %v533_v21 = vadd.f32 1.0, %v1948_v19 }
 0x7a2   :  { %v534_v22 = vadd.f32 1.0, %v1950_v20 }
 0x7a3   :  { %1951 = vrcp.f32 %v533_v21  ;;  %v546_v33 = vand.u32 2147483648, %v533_v21  ;;  %vm540_vm15 = vweird.f32 %v533_v21  ;;  %v544_v35 = vand.u32 2147483647, %v533_v21 }
 0x7a4   :  { %1953 = vrcp.f32 %v534_v22  ;;  %v561_v34 = vand.u32 2147483648, %v534_v22  ;;  %vm555_vm0 = vweird.f32 %v534_v22  ;;  %v559_v36 = vand.u32 2147483647, %v534_v22 }
 0x7a5   :  { %v547_v39 = vor.u32 1.1754944e-38, %v546_v33  ;;  %vm545_vm3 = vcmp.eq.f32.partialorder %v544_v35, 8.507059e+37 }
 0x7a6   :  { %v562_v40 = vor.u32 1.1754944e-38, %v561_v34  ;;  %vm560_vm4 = vcmp.eq.f32.partialorder %v559_v36, 8.507059e+37 }
 0x7a9   :  { %v1952_v23 = vpop.eup %1951 }
 0x7aa   :  { %v1954_v24 = vpop.eup %1953  ;;  %v536_v25 = vmul.f32 %v1952_v23, %v533_v21  ;;  %vm541_vm13 = vweird.f32 %v1952_v23 }
 0x7ab   :  { %v551_v26 = vmul.f32 %v1954_v24, %v534_v22  ;;  %vm556_vm14 = vweird.f32 %v1954_v24  ;;  %vm542_vm1 = vmor %vm540_vm15, %vm541_vm13 }
 0x7ac   :  { %v537_v27 = vsub.f32 1.0, %v536_v25  ;;  %vm557_vm2 = vmor %vm555_vm0, %vm556_vm14 }
 0x7ad   :  { %v552_v28 = vsub.f32 1.0, %v551_v26 }
 0x7ae   :  { %v538_v29 = vmul.f32 %v1952_v23, %v537_v27 }
 0x7af   :  { %v553_v30 = vmul.f32 %v1954_v24, %v552_v28 }
 0x7b0   :  { %v539_v31 = vadd.f32 %v1952_v23, %v538_v29 }
 0x7b1   :  { %v554_v32 = vadd.f32 %v1954_v24, %v553_v30 }
 0x7b2   :  { %v543_v37 = vsel %vm542_vm1, %v1952_v23, %v539_v31 }
 0x7b3   :  { %v558_v38 = vsel %vm557_vm2, %v1954_v24, %v554_v32  ;;  %v548_v42 = vsel %vm545_vm3, %v547_v39, %v543_v37 }
 0x7b4   :  { %v563_v44 = vsel %vm560_vm4, %v562_v40, %v558_v38  ;;  %v573_v49 = vmul.f32 %v569_v47, %v548_v42 }
 0x7b5   :  { %v574_v54 = vmul.f32 %v570_v57, %v563_v44 }
 0x811   :  { %v578_v41 = vpop.permute.xlu0 %577 }
 0x812   :  { %v580_v43 = vpop.permute.xlu1 %579  ;;  %v583_v45 = vmul.f32 %v578_v41, %v548_v42 }
 0x813   :  { %v584_v46 = vmul.f32 %v580_v43, %v563_v44 }
 0x814   :  { %587 = vrot.lane.b32.xlu2 %v583_v45, %s2248_s3 }
 0x815   :  { %589 = vrot.lane.b32.xlu0 %v584_v46, %s2248_s3 }
 0x86e   :  { %v588_v50 = vpop.permute.xlu2 %587 }
 0x86f   :  { %v2420_v52 = vadd.f32 %v588_v50, %v573_v49 }
 0x871   :  { %1955 = vtanh.f32 %v2420_v52 }
 0x877   :  { %v1956_v51 = vpop.eup %1955 }
 0x878   :  { %599 = vrot.lane.b32.xlu1 %v1956_v51, %s2241_s25 }
 0x887   :  { %v590_v48 = vpop.permute.xlu0 %589 }
 0x888   :  { %v2425_v58 = vadd.f32 %v590_v48, %v574_v54 }
 0x88a   :  { %1957 = vtanh.f32 %v2425_v58  ;;  %v685_v48 = vrot.slane %v2425_v58, 7 }
 0x890   :  { %v1958_v59 = vpop.eup %1957 }
 0x891   :  { %601 = vrot.lane.b32.xlu2 %v1958_v59, %s2241_s25 }
 0x8ea   :  { %v600_v53 = vpop.permute.xlu1 %599 }
 0x8eb   :  { %v602_v60 = vpop.permute.xlu2 %601  ;;  %v605_v61 = vmul.f32 %v600_v53, %v548_v42 }
 0x8ec   :  { %v606_v62 = vmul.f32 %v602_v60, %v563_v44 }
 0x8ed   :  { %v607_v63 = vpack.c.bf16 %v605_v61, %v605_v61 }
 0x8ee   :  { %v608_v0 = vpack.c.bf16 %v606_v62, %v606_v62  ;;  %v684_v62 = vrot.slane %v2420_v52, 7 }
 0x8ef   :  { %v611_v55 = vunpack.c.l.b16 %v607_v63 }
 0x8f0   :  { %v612_v1 = vunpack.c.l.b16 %v608_v0 }
 0x8f1   :  { %v613_v3 = vrot.slane %v611_v55, 3 }
 0x8f2   :  { %v614_v7 = vrot.slane %v612_v1, 2 }
 0x8f4   :  { %v615_v56 = vsel %vm271_vm9, %v614_v7, %v613_v3 }
 0x8f5   :  { %v616_v8 = vpack.c.b16 %v615_v56, %v615_v56 }
 0x8f7   :  { %617 = vrot.lane.b32.xlu0 %v616_v8, %s2248_s3 }
 0x969   :  { %v2443_v11 = vpop.permute.xlu0 %617 }
 0x96a   :  { %1801 = vmatmul.msk.bf16.vlgmr.msrb.gmra.mxu1 %vm167_vm10, %v2443_v11 }
 0x96b   :  { %1151 = vmatpush.bf16.msrb.mxu1 %v2431_v9 }
 0x96f   :  { %1152 = vmatpush.bf16.msrb.mxu1 %v2434_v10 }
 0x97a   :  { %1821 = vmatmul.msk.bf16.vlgmr.msra.gmra.mxu1 %vm167_vm10, %v2365_v4 }
 0x9e7   :  { %v631_v13 = vpop.f32.mrf.mxu1 }
 0x9e8   :  { %v636_v14 = vrot.slane %v631_v13, 4  ;;  %v637_v16 = vrot.slane %v631_v13, 5 }
 0x9ea   :  { %v640_v17 = vadd.f32 %v636_v14, %v2348_v15  ;;  %v641_v18 = vadd.f32 %v637_v16, %v2345_v12 }
 0x9ec   :  { %1959 = vtanh.f32 %v640_v17  ;;  %v1803_v4 = vmul.f32 -1.442695, %v641_v18  ;;  %v1802_v27 = vmul.f32 -1.442695, %v640_v17 }
 0x9ed   :  { %1961 = vtanh.f32 %v641_v18 }
 0x9ee   :  { %1963 = vpow2.f32 %v1803_v4 }
 0x9ef   :  { %v633_v19 = vpop.f32.mrf.mxu1 }
 0x9f2   :  { %v1960_v20 = vpop.eup %1959 }
 0x9f3   :  { %v1962_v21 = vpop.eup %1961  ;;  %692 = vrot.lane.b32.xlu1 %v1960_v20, %s2241_s25  ;;  %v2471_v20 = vld [vmem:[#allocation8 + $0x8] sm:$0xff] }
 0x9f4   :  { %694 = vrot.lane.b32.xlu2 %v1962_v21, %s2241_s25  ;;  %v1964_v24 = vpop.eup %1963  ;;  %1228 = vmatpush.bf16.msra.mxu1 %v2471_v20  ;;  %v2474_v21 = vld [vmem:[#allocation8] sm:$0xff] }
 0x9f5   :  { %v649_v25 = vadd.f32 1.0, %v1964_v24 }
 0x9f7   :  { %v2455_v22 = vpop.f32.mrf.mxu1  ;;  %1965 = vrcp.f32 %v649_v25  ;;  %v676_v34 = vand.u32 2147483648, %v649_v25  ;;  %vm670_vm6 = vweird.f32 %v649_v25  ;;  %v674_v35 = vand.u32 2147483647, %v649_v25 }
 0x9f8   :  { %1967 = vpow2.f32 %v1802_v27  ;;  %1229 = vmatpush.bf16.msra.mxu1 %v2474_v21 }
 0x9f9   :  { %v677_v37 = vor.u32 1.1754944e-38, %v676_v34  ;;  %vm675_vm8 = vcmp.eq.f32.partialorder %v674_v35, 8.507059e+37 }
 0x9fd   :  { %v1966_v26 = vpop.eup %1965 }
 0x9fe   :  { %v666_v28 = vmul.f32 %v1966_v26, %v649_v25  ;;  %v1968_v30 = vpop.eup %1967  ;;  %vm671_vm5 = vweird.f32 %v1966_v26 }
 0x9ff   :  { %v1104_v23 = vpop.f32.mrf.mxu1  ;;  %v648_v32 = vadd.f32 1.0, %v1968_v30  ;;  %vm672_vm7 = vmor %vm670_vm6, %vm671_vm5 }
 0xa00   :  { %v667_v29 = vsub.f32 1.0, %v666_v28 }
 0xa01   :  { %1969 = vrcp.f32 %v648_v32  ;;  %v661_v46 = vand.u32 2147483648, %v648_v32  ;;  %vm655_vm12 = vweird.f32 %v648_v32  ;;  %v659_v47 = vand.u32 2147483647, %v648_v32 }
 0xa02   :  { %v668_v31 = vmul.f32 %v1966_v26, %v667_v29 }
 0xa03   :  { %v662_v50 = vor.u32 1.1754944e-38, %v661_v46  ;;  %vm660_vm14 = vcmp.eq.f32.partialorder %v659_v47, 8.507059e+37 }
 0xa04   :  { %v669_v33 = vadd.f32 %v1966_v26, %v668_v31 }
 0xa06   :  { %v673_v36 = vsel %vm672_vm7, %v1966_v26, %v669_v33 }
 0xa07   :  { %v678_v39 = vsel %vm675_vm8, %v677_v37, %v673_v36  ;;  %v1970_v40 = vpop.eup %1969 }
 0xa08   :  { %v651_v42 = vmul.f32 %v1970_v40, %v648_v32  ;;  %vm656_vm11 = vweird.f32 %v1970_v40  ;;  %v689_v59 = vmul.f32 %v685_v48, %v678_v39 }
 0xa09   :  { %vm657_vm13 = vmor %vm655_vm12, %vm656_vm11 }
 0xa0a   :  { %v652_v43 = vsub.f32 1.0, %v651_v42 }
 0xa0c   :  { %v653_v44 = vmul.f32 %v1970_v40, %v652_v43 }
 0xa0e   :  { %v654_v45 = vadd.f32 %v1970_v40, %v653_v44 }
 0xa10   :  { %v658_v49 = vsel %vm657_vm13, %v1970_v40, %v654_v45 }
 0xa11   :  { %v663_v57 = vsel %vm660_vm14, %v662_v50, %v658_v49 }
 0xa12   :  { %v688_v63 = vmul.f32 %v684_v62, %v663_v57 }
 0xa4e   :  { %v695_v38 = vpop.permute.xlu2 %694 }
 0xa4f   :  { %v699_v41 = vmul.f32 %v695_v38, %v678_v39 }
 0xa51   :  { %704 = vrot.lane.b32.xlu1 %v699_v41, %s2248_s3 }
 0xa65   :  { %v693_v51 = vpop.permute.xlu1 %692 }
 0xa66   :  { %v698_v54 = vmul.f32 %v693_v51, %v663_v57 }
 0xa68   :  { %702 = vrot.lane.b32.xlu0 %v698_v54, %s2248_s3 }
 0xac3   :  { %v705_v53 = vpop.permute.xlu1 %704 }
 0xac4   :  { %v2460_v60 = vadd.f32 %v705_v53, %v689_v59 }
 0xac6   :  { %1971 = vtanh.f32 %v2460_v60 }
 0xacc   :  { %v1972_v61 = vpop.eup %1971 }
 0xacd   :  { %716 = vrot.lane.b32.xlu0 %v1972_v61, %s2241_s25 }
 0xada   :  { %v703_v0 = vpop.permute.xlu0 %702 }
 0xadb   :  { %v2465_v55 = vadd.f32 %v703_v0, %v688_v63 }
 0xadd   :  { %1973 = vtanh.f32 %v2465_v55 }
 0xae3   :  { %v1974_v1 = vpop.eup %1973 }
 0xae4   :  { %714 = vrot.lane.b32.xlu2 %v1974_v1, %s2241_s25 }
 0xb3e   :  { %v715_v58 = vpop.permute.xlu2 %714 }
 0xb3f   :  { %v717_v3 = vpop.permute.xlu0 %716  ;;  %v720_v7 = vmul.f32 %v715_v58, %v663_v57 }
 0xb40   :  { %v721_v56 = vmul.f32 %v717_v3, %v678_v39 }
 0xb41   :  { %v722_v8 = vpack.c.bf16 %v720_v7, %v720_v7 }
 0xb42   :  { %v723_v13 = vpack.c.bf16 %v721_v56, %v721_v56 }
 0xb43   :  { %v726_v14 = vunpack.c.l.b16 %v722_v8 }
 0xb44   :  { %v727_v16 = vunpack.c.l.b16 %v723_v13 }
 0xb45   :  { %v728_v17 = vrot.slane %v726_v14, 4 }
 0xb46   :  { %v729_v18 = vrot.slane %v727_v16, 3 }
 0xb48   :  { %v730_v52 = vsel %vm271_vm9, %v729_v18, %v728_v17 }
 0xb49   :  { %v731_v19 = vpack.c.b16 %v730_v52, %v730_v52 }
 0xb4b   :  { %732 = vrot.lane.b32.xlu1 %v731_v19, %s2248_s3 }
 0xbbd   :  { %v733_v23 = vpop.permute.xlu1 %732 }
 0xbbe   :  { %1804 = vmatmul.msk.bf16.vlgmr.msrb.gmra.mxu2 %vm167_vm10, %v733_v23  ;;  %1825 = vmatmul.msk.bf16.vlgmr.msrb.gmra.mxu1 %vm167_vm10, %v733_v23 }
 0xbbf   :  { %1164 = vmatpush.bf16.msrb.mxu2 %v2431_v9  ;;  %1460 = vmatpush.bf16.msrb.mxu1 %v2471_v20 }
 0xbc3   :  { %1165 = vmatpush.bf16.msrb.mxu2 %v2434_v10  ;;  %1461 = vmatpush.bf16.msrb.mxu1 %v2474_v21 }
 0xbce   :  { %1822 = vmatmul.msk.bf16.vlgmr.msra.gmra.mxu2 %vm167_vm10, %v2387_v2  ;;  %1230 = vmatmul.bf16.vlgmr.msra.gmra.mxu1 %v2247_v6  ;;  %v2495_v2 = vld [vmem:[%s2669_s6] ss:$0 sm:$0xff] }
 0xbcf   :  { %1286 = vmatpush.bf16.msra.mxu2 %v2471_v20  ;;  %v1103_v30 = vadd.f32 %v2495_v2, %v2455_v22 }
 0xbd3   :  { %1287 = vmatpush.bf16.msra.mxu2 %v2474_v21 }
 0xc3b   :  { %v2488_v4 = vpop.f32.mrf.mxu1 }
 0xc41   :  { %v746_v24 = vpop.f32.mrf.mxu2 }
 0xc42   :  { %v751_v25 = vrot.slane %v746_v24, 3  ;;  %v752_v26 = vrot.slane %v746_v24, 4 }
 0xc43   :  { %v1156_v27 = vpop.f32.mrf.mxu1 }
 0xc44   :  { %v755_v28 = vadd.f32 %v751_v25, %v2348_v15  ;;  %v756_v29 = vadd.f32 %v752_v26, %v2345_v12 }
 0xc46   :  { %1975 = vtanh.f32 %v755_v28  ;;  %v1805_v39 = vmul.f32 -1.442695, %v755_v28  ;;  %v1806_v42 = vmul.f32 -1.442695, %v756_v29 }
 0xc47   :  { %1977 = vtanh.f32 %v756_v29 }
 0xc49   :  { %v748_v6 = vpop.f32.mrf.mxu2 }
 0xc4b   :  { %v1231_v31 = vpop.f32.mrf.mxu1 }
 0xc4c   :  { %v1976_v32 = vpop.eup %1975  ;;  %v1235_v33 = vadd.f32 %v1231_v31, %v1103_v30 }
 0xc4d   :  { %v1978_v34 = vpop.eup %1977  ;;  %807 = vrot.lane.b32.xlu2 %v1976_v32, %s2241_s25  ;;  %v799_v32 = vrot.slane %v2465_v55, 7 }
 0xc4e   :  { %1979 = vtanh.f32 %v1235_v33  ;;  %809 = vrot.lane.b32.xlu0 %v1978_v34, %s2241_s25  ;;  %v1837_v45 = vmul.f32 -1.442695, %v1235_v33 }
 0xc4f   :  { %1981 = vpow2.f32 %v1805_v39 }
 0xc51   :  { %v2501_v35 = vpop.f32.mrf.mxu2 }
 0xc53   :  { %v1233_v36 = vpop.f32.mrf.mxu1 }
 0xc54   :  { %v1980_v37 = vpop.eup %1979 }
 0xc55   :  { %1258 = vrot.lane.b32.xlu1 %v1980_v37, %s2241_s25  ;;  %v1982_v40 = vpop.eup %1981 }
 0xc56   :  { %v763_v22 = vadd.f32 1.0, %v1982_v40 }
 0xc58   :  { %1983 = vrcp.f32 %v763_v22  ;;  %v776_v51 = vand.u32 2147483648, %v763_v22  ;;  %vm770_vm0 = vweird.f32 %v763_v22  ;;  %v774_v57 = vand.u32 2147483647, %v763_v22 }
 0xc59   :  { %v1117_v38 = vpop.f32.mrf.mxu2  ;;  %1985 = vpow2.f32 %v1806_v42 }
 0xc5a   :  { %1987 = vpow2.f32 %v1837_v45  ;;  %v777_v59 = vor.u32 1.1754944e-38, %v776_v51  ;;  %vm775_vm2 = vcmp.eq.f32.partialorder %v774_v57, 8.507059e+37  ;;  %v800_v38 = vrot.slane %v2460_v60, 7 }
 0xc5e   :  { %v1984_v41 = vpop.eup %1983 }
 0xc5f   :  { %v766_v43 = vmul.f32 %v1984_v41, %v763_v22  ;;  %v1986_v47 = vpop.eup %1985  ;;  %vm771_vm15 = vweird.f32 %v1984_v41 }
 0xc60   :  { %v764_v49 = vadd.f32 1.0, %v1986_v47  ;;  %vm772_vm1 = vmor %vm770_vm0, %vm771_vm15  ;;  %v1988_v54 = vpop.eup %1987 }
 0xc61   :  { %v767_v44 = vsub.f32 1.0, %v766_v43  ;;  %v1239_v53 = vadd.f32 1.0, %v1988_v54 }
 0xc62   :  { %1989 = vrcp.f32 %v764_v49  ;;  %v791_v14 = vand.u32 2147483648, %v764_v49  ;;  %vm785_vm4 = vweird.f32 %v764_v49  ;;  %v789_v16 = vand.u32 2147483647, %v764_v49 }
 0xc63   :  { %v768_v46 = vmul.f32 %v1984_v41, %v767_v44  ;;  %1991 = vrcp.f32 %v1239_v53  ;;  %v1251_v26 = vand.u32 2147483648, %v1239_v53  ;;  %vm1245_vm8 = vweird.f32 %v1239_v53 }
 0xc64   :  { %v792_v52 = vor.u32 1.1754944e-38, %v791_v14  ;;  %vm790_vm6 = vcmp.eq.f32.partialorder %v789_v16, 8.507059e+37  ;;  %v1249_v27 = vand.u32 2147483647, %v1239_v53 }
 0xc65   :  { %v769_v50 = vadd.f32 %v1984_v41, %v768_v46  ;;  %v1252_v29 = vor.u32 1.1754944e-38, %v1251_v26 }
 0xc66   :  { %vm1250_vm12 = vcmp.eq.f32.partialorder %v1249_v27, 8.507059e+37 }
 0xc67   :  { %v773_v48 = vsel %vm772_vm1, %v1984_v41, %v769_v50 }
 0xc68   :  { %v778_v62 = vsel %vm775_vm2, %v777_v59, %v773_v48  ;;  %v1990_v0 = vpop.eup %1989 }
 0xc69   :  { %v781_v1 = vmul.f32 %v1990_v0, %v764_v49  ;;  %v1992_v58 = vpop.eup %1991  ;;  %vm786_vm3 = vweird.f32 %v1990_v0  ;;  %v803_v33 = vmul.f32 %v799_v32, %v778_v62 }
 0xc6a   :  { %v1241_v7 = vmul.f32 %v1992_v58, %v1239_v53  ;;  %vm787_vm5 = vmor %vm785_vm4, %vm786_vm3  ;;  %vm1246_vm7 = vweird.f32 %v1992_v58 }
 0xc6b   :  { %v782_v3 = vsub.f32 1.0, %v781_v1  ;;  %vm1247_vm11 = vmor %vm1245_vm8, %vm1246_vm7 }
 0xc6c   :  { %v1242_v8 = vsub.f32 1.0, %v1241_v7 }
 0xc6d   :  { %v783_v56 = vmul.f32 %v1990_v0, %v782_v3 }
 0xc6e   :  { %v1243_v17 = vmul.f32 %v1992_v58, %v1242_v8 }
 0xc6f   :  { %v784_v13 = vadd.f32 %v1990_v0, %v783_v56 }
 0xc70   :  { %v1244_v24 = vadd.f32 %v1992_v58, %v1243_v17 }
 0xc71   :  { %v788_v18 = vsel %vm787_vm5, %v1990_v0, %v784_v13 }
 0xc72   :  { %v793_v23 = vsel %vm790_vm6, %v792_v52, %v788_v18  ;;  %v1248_v28 = vsel %vm1247_vm11, %v1992_v58, %v1244_v24  ;;  %v1116_v52 = vadd.f32 %v2495_v2, %v2501_v35 }
 0xc73   :  { %v1253_v30 = vsel %vm1250_vm12, %v1252_v29, %v1248_v28  ;;  %v804_v39 = vmul.f32 %v800_v38, %v793_v23 }
 0xc74   :  { %v1256_v41 = vmul.f32 0.0, %v1253_v30 }
 0xca7   :  { %v808_v61 = vpop.permute.xlu2 %807 }
 0xca8   :  { %v813_v63 = vmul.f32 %v808_v61, %v778_v62 }
 0xcaa   :  { %817 = vrot.lane.b32.xlu2 %v813_v63, %s2248_s3 }
 0xcc0   :  { %v810_v19 = vpop.permute.xlu0 %809 }
 0xcc1   :  { %v814_v25 = vmul.f32 %v810_v19, %v793_v23 }
 0xcc3   :  { %819 = vrot.lane.b32.xlu0 %v814_v25, %s2248_s3 }
 0xcc7   :  { %v1259_v6 = vpop.permute.xlu1 %1258 }
 0xcc8   :  { %v1261_v31 = vmul.f32 %v1259_v6, %v1253_v30 }
 0xcca   :  { %1263 = vrot.lane.b32.xlu1 %v1261_v31, %s2248_s3 }
 0xd04   :  { %v818_v34 = vpop.permute.xlu2 %817 }
 0xd05   :  { %v2508_v36 = vadd.f32 %v818_v34, %v803_v33 }
 0xd07   :  { %1993 = vtanh.f32 %v2508_v36 }
 0xd0d   :  { %v1994_v37 = vpop.eup %1993 }
 0xd0e   :  { %829 = vrot.lane.b32.xlu2 %v1994_v37, %s2241_s25 }
 0xd35   :  { %v820_v40 = vpop.permute.xlu0 %819 }
 0xd36   :  { %v2513_v22 = vadd.f32 %v820_v40, %v804_v39 }
 0xd38   :  { %1995 = vtanh.f32 %v2513_v22 }
 0xd3c   :  { %v1264_v42 = vpop.permute.xlu1 %1263 }
 0xd3d   :  { %v2516_v55 = vadd.f32 %v1264_v42, %v1256_v41 }
 0xd3e   :  { %v1996_v43 = vpop.eup %1995 }
 0xd3f   :  { %1997 = vtanh.f32 %v2516_v55  ;;  %831 = vrot.lane.b32.xlu0 %v1996_v43, %s2241_s25 }
 0xd45   :  { %v1998_v44 = vpop.eup %1997 }
 0xd46   :  { %1269 = vrot.lane.b32.xlu1 %v1998_v44, %s2241_s25 }
 0xd68   :  { %v830_v45 = vpop.permute.xlu2 %829 }
 0xd69   :  { %v835_v60 = vmul.f32 %v830_v45, %v778_v62 }
 0xd6b   :  { %v837_v46 = vpack.c.bf16 %v835_v60, %v835_v60 }
 0xd6d   :  { %v841_v50 = vunpack.c.l.b16 %v837_v46 }
 0xd6f   :  { %v843_v54 = vrot.slane %v841_v50, 5 }
 0xdb1   :  { %v832_v47 = vpop.permute.xlu0 %831 }
 0xdb2   :  { %v836_v49 = vmul.f32 %v832_v47, %v793_v23 }
 0xdb4   :  { %v838_v51 = vpack.c.bf16 %v836_v49, %v836_v49 }
 0xdb6   :  { %v842_v57 = vunpack.c.l.b16 %v838_v51 }
 0xdb8   :  { %v844_v48 = vrot.slane %v842_v57, 4  ;;  %v1270_v59 = vpop.permute.xlu1 %1269 }
 0xdb9   :  { %v1272_v53 = vmul.f32 %v1270_v59, %v1253_v30 }
 0xdba   :  { %v845_v61 = vsel %vm271_vm9, %v844_v48, %v843_v54 }
 0xdbb   :  { %v1273_v63 = vpack.c.bf16 %v1272_v53, %v1272_v53  ;;  %v846_v0 = vpack.c.b16 %v845_v61, %v845_v61 }
 0xdbd   :  { %847 = vrot.lane.b32.xlu2 %v846_v0, %s2248_s3  ;;  %1275 = vrot.lane.b32.xlu0 %v1273_v63, %s2248_s3 }
 0xe17   :  { %v848_v1 = vpop.permute.xlu2 %847 }
 0xe18   :  { %1807 = vmatmul.msk.bf16.vlgmr.msrb.gmra.mxu3 %vm167_vm10, %v848_v1  ;;  %1826 = vmatmul.msk.bf16.vlgmr.msrb.gmra.mxu2 %vm167_vm10, %v848_v1 }
 0xe19   :  { %1177 = vmatpush.bf16.msrb.mxu3 %v2431_v9  ;;  %1518 = vmatpush.bf16.msrb.mxu2 %v2471_v20 }
 0xe1d   :  { %1178 = vmatpush.bf16.msrb.mxu3 %v2434_v10  ;;  %1519 = vmatpush.bf16.msrb.mxu2 %v2474_v21 }
 0xe28   :  { %1823 = vmatmul.msk.bf16.vlgmr.msra.gmra.mxu3 %vm167_vm10, %v2409_v5 }
 0xe29   :  { %1344 = vmatpush.bf16.msra.mxu3 %v2471_v20 }
 0xe2d   :  { %1345 = vmatpush.bf16.msra.mxu3 %v2474_v21 }
 0xe2f   :  { %v1276_v62 = vpop.permute.xlu0 %1275 }
 0xe30   :  { %1838 = vmatmul.msk.bf16.vlgmr.msra.gmra.mxu2 %vm167_vm10, %v1276_v62 }
 0xe9b   :  { %v861_v58 = vpop.f32.mrf.mxu3  ;;  %v2535_v3 = vpop.f32.mrf.mxu2 }
 0xe9c   :  { %v866_v7 = vrot.slane %v861_v58, 2  ;;  %v867_v56 = vrot.slane %v861_v58, 3 }
 0xe9e   :  { %v870_v8 = vadd.f32 %v866_v7, %v2348_v15  ;;  %v871_v13 = vadd.f32 %v867_v56, %v2345_v12 }
 0xea0   :  { %1999 = vtanh.f32 %v870_v8  ;;  %v1809_v27 = vmul.f32 -1.442695, %v871_v13  ;;  %v1808_v30 = vmul.f32 -1.442695, %v870_v8 }
 0xea1   :  { %2001 = vtanh.f32 %v871_v13 }
 0xea3   :  { %v863_v14 = vpop.f32.mrf.mxu3  ;;  %v1169_v5 = vpop.f32.mrf.mxu2 }
 0xea6   :  { %v2000_v16 = vpop.eup %1999 }
 0xea7   :  { %v2002_v17 = vpop.eup %2001  ;;  %922 = vrot.lane.b32.xlu1 %v2000_v16, %s2241_s25 }
 0xea8   :  { %924 = vrot.lane.b32.xlu2 %v2002_v17, %s2241_s25 }
 0xeab   :  { %v2541_v18 = vpop.f32.mrf.mxu3 }
 0xeb3   :  { %v1130_v19 = vpop.f32.mrf.mxu3  ;;  %v1289_v23 = vpop.f32.mrf.mxu2 }
 0xeb4   :  { %v1293_v24 = vadd.f32 %v1289_v23, %v1116_v52  ;;  %v915_v19 = vrot.slane %v2513_v22, 7 }
 0xeb6   :  { %2003 = vtanh.f32 %v1293_v24  ;;  %v1839_v42 = vmul.f32 -1.442695, %v1293_v24 }
 0xeb7   :  { %2005 = vpow2.f32 %v1809_v27  ;;  %v914_v27 = vrot.slane %v2508_v36, 7 }
 0xebb   :  { %v1291_v25 = vpop.f32.mrf.mxu2 }
 0xebc   :  { %v2004_v26 = vpop.eup %2003 }
 0xebd   :  { %1316 = vrot.lane.b32.xlu0 %v2004_v26, %s2241_s25  ;;  %v2006_v28 = vpop.eup %2005 }
 0xebe   :  { %v879_v29 = vadd.f32 1.0, %v2006_v28 }
 0xec0   :  { %2007 = vrcp.f32 %v879_v29  ;;  %v906_v38 = vand.u32 2147483648, %v879_v29  ;;  %vm900_vm14 = vweird.f32 %v879_v29  ;;  %v904_v39 = vand.u32 2147483647, %v879_v29 }
 0xec1   :  { %2009 = vpow2.f32 %v1808_v30 }
 0xec2   :  { %v907_v41 = vor.u32 1.1754944e-38, %v906_v38  ;;  %vm905_vm0 = vcmp.eq.f32.partialorder %v904_v39, 8.507059e+37 }
 0xec6   :  { %v2008_v6 = vpop.eup %2007 }
 0xec7   :  { %v896_v31 = vmul.f32 %v2008_v6, %v879_v29  ;;  %v2010_v33 = vpop.eup %2009  ;;  %vm901_vm13 = vweird.f32 %v2008_v6 }
 0xec8   :  { %v878_v34 = vadd.f32 1.0, %v2010_v33  ;;  %vm902_vm15 = vmor %vm900_vm14, %vm901_vm13 }
 0xec9   :  { %v897_v32 = vsub.f32 1.0, %v896_v31 }
 0xeca   :  { %2011 = vrcp.f32 %v878_v34  ;;  %v891_v54 = vand.u32 2147483648, %v878_v34  ;;  %vm885_vm2 = vweird.f32 %v878_v34  ;;  %v889_v48 = vand.u32 2147483647, %v878_v34 }
 0xecb   :  { %v898_v35 = vmul.f32 %v2008_v6, %v897_v32  ;;  %2013 = vpow2.f32 %v1839_v42 }
 0xecc   :  { %v892_v53 = vor.u32 1.1754944e-38, %v891_v54  ;;  %vm890_vm4 = vcmp.eq.f32.partialorder %v889_v48, 8.507059e+37 }
 0xecd   :  { %v899_v37 = vadd.f32 %v2008_v6, %v898_v35 }
 0xecf   :  { %v903_v40 = vsel %vm902_vm15, %v2008_v6, %v899_v37 }
 0xed0   :  { %v908_v44 = vsel %vm905_vm0, %v907_v41, %v903_v40  ;;  %v2012_v45 = vpop.eup %2011 }
 0xed1   :  { %v881_v46 = vmul.f32 %v2012_v45, %v878_v34  ;;  %v2014_v49 = vpop.eup %2013  ;;  %vm886_vm1 = vweird.f32 %v2012_v45  ;;  %v919_v23 = vmul.f32 %v915_v19, %v908_v44 }
 0xed2   :  { %v1297_v51 = vadd.f32 1.0, %v2014_v49  ;;  %vm887_vm3 = vmor %vm885_vm2, %vm886_vm1 }
 0xed3   :  { %v882_v47 = vsub.f32 1.0, %v881_v46 }
 0xed4   :  { %2015 = vrcp.f32 %v1297_v51  ;;  %v1309_v8 = vand.u32 2147483648, %v1297_v51  ;;  %vm1303_vm6 = vweird.f32 %v1297_v51  ;;  %v1307_v13 = vand.u32 2147483647, %v1297_v51 }
 0xed5   :  { %v883_v50 = vmul.f32 %v2012_v45, %v882_v47 }
 0xed6   :  { %v1310_v5 = vor.u32 1.1754944e-38, %v1309_v8  ;;  %vm1308_vm8 = vcmp.eq.f32.partialorder %v1307_v13, 8.507059e+37 }
 0xed7   :  { %v884_v57 = vadd.f32 %v2012_v45, %v883_v50 }
 0xed9   :  { %v888_v59 = vsel %vm887_vm3, %v2012_v45, %v884_v57 }
 0xeda   :  { %v2016_v61 = vpop.eup %2015  ;;  %v893_v0 = vsel %vm890_vm4, %v892_v53, %v888_v59 }
 0xedb   :  { %v1299_v62 = vmul.f32 %v2016_v61, %v1297_v51  ;;  %vm1304_vm5 = vweird.f32 %v2016_v61  ;;  %v918_v28 = vmul.f32 %v914_v27, %v893_v0 }
 0xedc   :  { %vm1305_vm7 = vmor %vm1303_vm6, %vm1304_vm5 }
 0xedd   :  { %v1300_v58 = vsub.f32 1.0, %v1299_v62 }
 0xedf   :  { %v1301_v7 = vmul.f32 %v2016_v61, %v1300_v58 }
 0xee1   :  { %v1302_v56 = vadd.f32 %v2016_v61, %v1301_v7 }
 0xee3   :  { %v1306_v14 = vsel %vm1305_vm7, %v2016_v61, %v1302_v56 }
 0xee4   :  { %v1311_v17 = vsel %vm1308_vm8, %v1310_v5, %v1306_v14 }
 0xee5   :  { %v1314_v22 = vmul.f32 %v1311_v17, %v2516_v55 }
 0xf02   :  { %v925_v43 = vpop.permute.xlu2 %924 }
 0xf03   :  { %v929_v60 = vmul.f32 %v925_v43, %v908_v44 }
 0xf05   :  { %934 = vrot.lane.b32.xlu2 %v929_v60, %s2248_s3 }
 0xf19   :  { %v923_v63 = vpop.permute.xlu1 %922 }
 0xf1a   :  { %v928_v1 = vmul.f32 %v923_v63, %v893_v0  ;;  %v1129_v63 = vadd.f32 %v2495_v2, %v2541_v18 }
 0xf1c   :  { %932 = vrot.lane.b32.xlu1 %v928_v1, %s2248_s3 }
 0xf2f   :  { %v1317_v16 = vpop.permute.xlu0 %1316 }
 0xf30   :  { %v1319_v52 = vmul.f32 %v1317_v16, %v1311_v17 }
 0xf32   :  { %1321 = vrot.lane.b32.xlu0 %v1319_v52, %s2248_s3 }
 0xf5f   :  { %v935_v24 = vpop.permute.xlu2 %934 }
 0xf60   :  { %v2550_v25 = vadd.f32 %v935_v24, %v919_v23 }
 0xf62   :  { %2017 = vtanh.f32 %v2550_v25 }
 0xf68   :  { %v2018_v26 = vpop.eup %2017 }
 0xf69   :  { %946 = vrot.lane.b32.xlu2 %v2018_v26, %s2241_s25 }
 0xf8e   :  { %v933_v29 = vpop.permute.xlu1 %932 }
 0xf8f   :  { %v2555_v6 = vadd.f32 %v933_v29, %v918_v28 }
 0xf91   :  { %2019 = vtanh.f32 %v2555_v6 }
 0xf97   :  { %v2020_v30 = vpop.eup %2019 }
 0xf98   :  { %944 = vrot.lane.b32.xlu1 %v2020_v30, %s2241_s25 }
 0xfa4   :  { %v1322_v31 = vpop.permute.xlu0 %1321 }
 0xfa5   :  { %v2560_v32 = vadd.f32 %v1322_v31, %v1314_v22 }
 0xfa7   :  { %2021 = vtanh.f32 %v2560_v32 }
 0xfad   :  { %v2022_v33 = vpop.eup %2021 }
 0xfae   :  { %1327 = vrot.lane.b32.xlu0 %v2022_v33, %s2241_s25 }
 0xfc3   :  { %v947_v36 = vpop.permute.xlu2 %946 }
 0xfc4   :  { %v951_v35 = vmul.f32 %v947_v36, %v908_v44 }
 0xfc6   :  { %v953_v34 = vpack.c.bf16 %v951_v35, %v951_v35 }
 0xfc8   :  { %v957_v39 = vunpack.c.l.b16 %v953_v34 }
 0xfca   :  { %v959_v42 = vrot.slane %v957_v39, 5 }
0x100a   :  { %v945_v37 = vpop.permute.xlu1 %944 }
0x100b   :  { %v950_v38 = vmul.f32 %v945_v37, %v893_v0 }
0x100d   :  { %v952_v40 = vpack.c.bf16 %v950_v38, %v950_v38 }
0x100f   :  { %v956_v41 = vunpack.c.l.b16 %v952_v40 }
0x1011   :  { %v958_v43 = vrot.slane %v956_v41, 6 }
0x1013   :  { %v960_v55 = vsel %vm271_vm9, %v959_v42, %v958_v43 }
0x1014   :  { %v961_v45 = vpack.c.b16 %v960_v55, %v960_v55 }
0x1016   :  { %962 = vrot.lane.b32.xlu1 %v961_v45, %s2248_s3 }
0x1020   :  { %v1328_v60 = vpop.permute.xlu0 %1327 }
0x1021   :  { %v1330_v46 = vmul.f32 %v1328_v60, %v1311_v17 }
0x1023   :  { %v1331_v47 = vpack.c.bf16 %v1330_v46, %v1330_v46 }
0x1025   :  { %1333 = vrot.lane.b32.xlu2 %v1331_v47, %s2248_s3 }
0x107f   :  { %v1334_v44 = vpop.permute.xlu2 %1333 }
0x1088   :  { %v963_v49 = vpop.permute.xlu1 %962 }
0x1089   :  { %1810 = vmatmul.msk.bf16.vlgmr.msra.gmra.mxu0 %vm167_vm10, %v963_v49  ;;  %1827 = vmatmul.msk.bf16.vlgmr.msrb.gmra.mxu3 %vm167_vm10, %v963_v49 }
0x108a   :  { %1203 = vmatpush.bf16.msra.mxu0 %v2431_v9  ;;  %1576 = vmatpush.bf16.msrb.mxu3 %v2471_v20 }
0x108e   :  { %1204 = vmatpush.bf16.msra.mxu0 %v2434_v10  ;;  %1577 = vmatpush.bf16.msrb.mxu3 %v2474_v21 }
0x1099   :  { %1824 = vmatmul.msk.bf16.vlgmr.msrb.gmra.mxu0 %vm167_vm10, %v2443_v11  ;;  %1840 = vmatmul.msk.bf16.vlgmr.msra.gmra.mxu3 %vm167_vm10, %v1334_v44 }
0x109a   :  { %1402 = vmatpush.bf16.msrb.mxu0 %v2471_v20 }
0x109e   :  { %1403 = vmatpush.bf16.msrb.mxu0 %v2474_v21 }
0x1106   :  { %v976_v50 = vpop.f32.mrf.mxu0 }
0x1107   :  { %v981_v51 = vrot.slane %v976_v50, 1  ;;  %v982_v57 = vrot.slane %v976_v50, 2 }
0x1109   :  { %v985_v9 = vadd.f32 %v981_v51, %v2348_v15  ;;  %v986_v54 = vadd.f32 %v982_v57, %v2345_v12 }
0x110b   :  { %2023 = vtanh.f32 %v985_v9  ;;  %v1811_v7 = vmul.f32 -1.442695, %v985_v9  ;;  %v1812_v56 = vmul.f32 -1.442695, %v986_v54 }
0x110c   :  { %2025 = vtanh.f32 %v986_v54  ;;  %v2580_v10 = vpop.f32.mrf.mxu3 }
0x110e   :  { %v978_v48 = vpop.f32.mrf.mxu0 }
0x1111   :  { %v2024_v59 = vpop.eup %2023 }
0x1112   :  { %v2026_v11 = vpop.eup %2025  ;;  %1037 = vrot.lane.b32.xlu0 %v2024_v59, %s2241_s25 }
0x1113   :  { %1039 = vrot.lane.b32.xlu1 %v2026_v11, %s2241_s25 }
0x1114   :  { %v1182_v53 = vpop.f32.mrf.mxu3 }
0x1116   :  { %v2584_v61 = vpop.f32.mrf.mxu0 }
0x111c   :  { %v1347_v15 = vpop.f32.mrf.mxu3 }
0x111d   :  { %v1351_v0 = vadd.f32 %v1347_v15, %v1129_v63  ;;  %v1029_v15 = vrot.slane %v2555_v6, 7 }
0x111e   :  { %v1143_v12 = vpop.f32.mrf.mxu0 }
0x111f   :  { %2027 = vtanh.f32 %v1351_v0  ;;  %v1841_v58 = vmul.f32 -1.442695, %v1351_v0  ;;  %v1030_v0 = vrot.slane %v2550_v25, 7 }
0x1121   :  { %2029 = vpow2.f32 %v1841_v58 }
0x1122   :  { %2031 = vpow2.f32 %v1811_v7 }
0x1123   :  { %2033 = vpow2.f32 %v1812_v56 }
0x1124   :  { %v1349_v1 = vpop.f32.mrf.mxu3 }
0x1125   :  { %v2028_v62 = vpop.eup %2027 }
0x1126   :  { %1374 = vrot.lane.b32.xlu2 %v2028_v62, %s2241_s25 }
0x1127   :  { %v2030_v8 = vpop.eup %2029 }
0x1128   :  { %v1355_v13 = vadd.f32 1.0, %v2030_v8  ;;  %v2032_v14 = vpop.eup %2031 }
0x1129   :  { %v2034_v5 = vpop.eup %2033  ;;  %v993_v16 = vadd.f32 1.0, %v2032_v14 }
0x112a   :  { %2035 = vrcp.f32 %v1355_v13  ;;  %v994_v18 = vadd.f32 1.0, %v2034_v5  ;;  %v1367_v33 = vand.u32 2147483648, %v1355_v13  ;;  %vm1361_vm12 = vweird.f32 %v1355_v13 }
0x112b   :  { %2037 = vrcp.f32 %v993_v16  ;;  %v1365_v35 = vand.u32 2147483647, %v1355_v13  ;;  %v1006_v40 = vand.u32 2147483648, %v993_v16  ;;  %vm1000_vm1 = vweird.f32 %v993_v16 }
0x112c   :  { %2039 = vrcp.f32 %v994_v18  ;;  %v1368_v38 = vor.u32 1.1754944e-38, %v1367_v33  ;;  %v1021_v41 = vand.u32 2147483648, %v994_v18  ;;  %v1004_v42 = vand.u32 2147483647, %v993_v16 }
0x112d   :  { %vm1366_vm0 = vcmp.eq.f32.partialorder %v1365_v35, 8.507059e+37  ;;  %vm1015_vm2 = vweird.f32 %v994_v18  ;;  %v1019_v45 = vand.u32 2147483647, %v994_v18  ;;  %v1007_v49 = vor.u32 1.1754944e-38, %v1006_v40 }
0x112e   :  { %v1022_v44 = vor.u32 1.1754944e-38, %v1021_v41  ;;  %vm1005_vm5 = vcmp.eq.f32.partialorder %v1004_v42, 8.507059e+37  ;;  %v1142_v33 = vadd.f32 %v2495_v2, %v2584_v61 }
0x112f   :  { %vm1020_vm6 = vcmp.eq.f32.partialorder %v1019_v45, 8.507059e+37 }
0x1130   :  { %v2036_v17 = vpop.eup %2035 }
0x1131   :  { %v1357_v52 = vmul.f32 %v2036_v17, %v1355_v13  ;;  %v2038_v19 = vpop.eup %2037  ;;  %vm1362_vm11 = vweird.f32 %v2036_v17 }
0x1132   :  { %v2040_v23 = vpop.eup %2039  ;;  %v996_v26 = vmul.f32 %v2038_v19, %v993_v16  ;;  %vm1363_vm13 = vmor %vm1361_vm12, %vm1362_vm11  ;;  %vm1001_vm14 = vweird.f32 %v2038_v19 }
0x1133   :  { %v1358_v24 = vsub.f32 1.0, %v1357_v52  ;;  %v1011_v27 = vmul.f32 %v2040_v23, %v994_v18  ;;  %vm1016_vm15 = vweird.f32 %v2040_v23  ;;  %vm1002_vm3 = vmor %vm1000_vm1, %vm1001_vm14 }
0x1134   :  { %v997_v29 = vsub.f32 1.0, %v996_v26  ;;  %vm1017_vm4 = vmor %vm1015_vm2, %vm1016_vm15 }
0x1135   :  { %v1359_v28 = vmul.f32 %v2036_v17, %v1358_v24  ;;  %v1012_v30 = vsub.f32 1.0, %v1011_v27 }
0x1136   :  { %v998_v31 = vmul.f32 %v2038_v19, %v997_v29 }
0x1137   :  { %v1360_v22 = vadd.f32 %v2036_v17, %v1359_v28  ;;  %v1013_v36 = vmul.f32 %v2040_v23, %v1012_v30 }
0x1138   :  { %v999_v37 = vadd.f32 %v2038_v19, %v998_v31 }
0x1139   :  { %v1364_v34 = vsel %vm1363_vm13, %v2036_v17, %v1360_v22  ;;  %v1014_v39 = vadd.f32 %v2040_v23, %v1013_v36 }
0x113a   :  { %v1369_v55 = vsel %vm1366_vm0, %v1368_v38, %v1364_v34  ;;  %v1003_v46 = vsel %vm1002_vm3, %v2038_v19, %v999_v37 }
0x113b   :  { %v1018_v47 = vsel %vm1017_vm4, %v2040_v23, %v1014_v39  ;;  %v1008_v50 = vsel %vm1005_vm5, %v1007_v49, %v1003_v46  ;;  %v1372_v59 = vmul.f32 %v1369_v55, %v2560_v32 }
0x113c   :  { %v1023_v9 = vsel %vm1020_vm6, %v1022_v44, %v1018_v47  ;;  %v1033_v12 = vmul.f32 %v1029_v15, %v1008_v50 }
0x113d   :  { %v1034_v1 = vmul.f32 %v1030_v0, %v1023_v9 }
0x1180   :  { %v1375_v43 = vpop.permute.xlu2 %1374 }
0x1181   :  { %v1377_v60 = vmul.f32 %v1375_v43, %v1369_v55 }
0x1183   :  { %1379 = vrot.lane.b32.xlu2 %v1377_v60, %s2248_s3 }
0x1184   :  { %v1038_v51 = vpop.permute.xlu0 %1037 }
0x1185   :  { %v1040_v57 = vpop.permute.xlu1 %1039  ;;  %v1043_v54 = vmul.f32 %v1038_v51, %v1008_v50 }
0x1186   :  { %v1044_v48 = vmul.f32 %v1040_v57, %v1023_v9 }
0x1187   :  { %1047 = vrot.lane.b32.xlu0 %v1043_v54, %s2248_s3 }
0x1188   :  { %1049 = vrot.lane.b32.xlu1 %v1044_v48, %s2248_s3 }
0x11dd   :  { %v1380_v11 = vpop.permute.xlu2 %1379 }
0x11de   :  { %v2593_v53 = vadd.f32 %v1380_v11, %v1372_v59  ;;  %v1155_v11 = vadd.f32 %v2495_v2, %v2488_v4 }
0x11e0   :  { %2041 = vtanh.f32 %v2593_v53 }
0x11e6   :  { %v2042_v63 = vpop.eup %2041 }
0x11e7   :  { %1385 = vrot.lane.b32.xlu2 %v2042_v63, %s2241_s25 }
0x11f9   :  { %v1048_v62 = vpop.permute.xlu0 %1047 }
0x11fa   :  { %v1050_v58 = vpop.permute.xlu1 %1049  ;;  %v1053_v7 = vadd.f32 %v1048_v62, %v1033_v12 }
0x11fb   :  { %v1054_v56 = vadd.f32 %v1050_v58, %v1034_v1 }
0x11fc   :  { %2043 = vtanh.f32 %v1053_v7 }
0x11fd   :  { %2045 = vtanh.f32 %v1054_v56 }
0x1202   :  { %v2044_v32 = vpop.eup %2043 }
0x1203   :  { %v2046_v8 = vpop.eup %2045  ;;  %1059 = vrot.lane.b32.xlu0 %v2044_v32, %s2241_s25 }
0x1204   :  { %1061 = vrot.lane.b32.xlu1 %v2046_v8, %s2241_s25 }
0x1241   :  { %v1386_v13 = vpop.permute.xlu2 %1385 }
0x1242   :  { %v1388_v14 = vmul.f32 %v1386_v13, %v1369_v55 }
0x1244   :  { %v1389_v5 = vpack.c.bf16 %v1388_v14, %v1388_v14 }
0x1246   :  { %1391 = vrot.lane.b32.xlu1 %v1389_v5, %s2248_s3 }
0x1275   :  { %v1060_v25 = vpop.permute.xlu0 %1059 }
0x1276   :  { %v1062_v6 = vpop.permute.xlu1 %1061  ;;  %v1065_v16 = vmul.f32 %v1060_v25, %v1008_v50 }
0x1277   :  { %v1066_v18 = vmul.f32 %v1062_v6, %v1023_v9 }
0x1278   :  { %v1067_v17 = vpack.c.bf16 %v1065_v16, %v1065_v16 }
0x1279   :  { %v1068_v52 = vpack.c.bf16 %v1066_v18, %v1066_v18 }
0x127a   :  { %v1186_v19 = vunpack.c.l.b16 %v1067_v17 }
0x127b   :  { %v1187_v23 = vunpack.c.l.b16 %v1068_v52 }
0x127c   :  { %v1188_v24 = vrot.slane %v1186_v19, 7 }
0x127d   :  { %v1189_v26 = vrot.slane %v1187_v23, 6 }
0x127f   :  { %v1190_v27 = vsel %vm271_vm9, %v1189_v26, %v1188_v24 }
0x1280   :  { %v1191_v28 = vpack.c.b16 %v1190_v27, %v1190_v27 }
0x1282   :  { %1192 = vrot.lane.b32.xlu0 %v1191_v28, %s2248_s3  ;;  %v1168_v28 = vadd.f32 %v2495_v2, %v2535_v3 }
0x12b8   :  { %v1392_v30 = vpop.permute.xlu1 %1391 }
0x12f4   :  { %v1193_v29 = vpop.permute.xlu0 %1192 }
0x12f5   :  { %1828 = vmatmul.msk.bf16.vlgmr.msra.gmra.mxu0 %vm167_vm10, %v1193_v29 }
0x12f6   :  { %1634 = vmatpush.bf16.msra.mxu0 %v2471_v20 }
0x12fa   :  { %1635 = vmatpush.bf16.msra.mxu0 %v2474_v21 }
0x1305   :  { %1842 = vmatmul.msk.bf16.vlgmr.msrb.gmra.mxu0 %vm167_vm10, %v1392_v30 }
0x1372   :  { %v2608_v22 = vpop.f32.mrf.mxu0 }
0x137a   :  { %v1208_v31 = vpop.f32.mrf.mxu0 }
0x1382   :  { %v1405_v36 = vpop.f32.mrf.mxu0 }
0x1383   :  { %v1409_v35 = vadd.f32 %v1405_v36, %v1142_v33 }
0x1385   :  { %2047 = vtanh.f32 %v1409_v35  ;;  %v1843_v38 = vmul.f32 -1.442695, %v1409_v35 }
0x1387   :  { %2049 = vpow2.f32 %v1843_v38 }
0x138a   :  { %v1407_v34 = vpop.f32.mrf.mxu0 }
0x138b   :  { %v2048_v37 = vpop.eup %2047 }
0x138c   :  { %1432 = vrot.lane.b32.xlu2 %v2048_v37, %s2241_s25 }
0x138d   :  { %v2050_v20 = vpop.eup %2049 }
0x138e   :  { %v1413_v21 = vadd.f32 1.0, %v2050_v20 }
0x1390   :  { %2051 = vrcp.f32 %v1413_v21  ;;  %v1425_v55 = vand.u32 2147483648, %v1413_v21  ;;  %vm1419_vm7 = vweird.f32 %v1413_v21  ;;  %v1423_v61 = vand.u32 2147483647, %v1413_v21 }
0x1392   :  { %v1426_v60 = vor.u32 1.1754944e-38, %v1425_v55  ;;  %vm1424_vm11 = vcmp.eq.f32.partialorder %v1423_v61, 8.507059e+37 }
0x1396   :  { %v2052_v39 = vpop.eup %2051 }
0x1397   :  { %v1415_v40 = vmul.f32 %v2052_v39, %v1413_v21  ;;  %vm1420_vm9 = vweird.f32 %v2052_v39 }
0x1398   :  { %vm1421_vm8 = vmor %vm1419_vm7, %vm1420_vm9 }
0x1399   :  { %v1416_v41 = vsub.f32 1.0, %v1415_v40 }
0x139b   :  { %v1417_v42 = vmul.f32 %v2052_v39, %v1416_v41 }
0x139d   :  { %v1418_v43 = vadd.f32 %v2052_v39, %v1417_v42 }
0x139f   :  { %v1422_v45 = vsel %vm1421_vm8, %v2052_v39, %v1418_v43 }
0x13a0   :  { %v1427_v47 = vsel %vm1424_vm11, %v1426_v60, %v1422_v45 }
0x13a1   :  { %v1430_v44 = vmul.f32 %v1427_v47, %v2593_v53 }
0x13e6   :  { %v1433_v46 = vpop.permute.xlu2 %1432 }
0x13e7   :  { %v1435_v49 = vmul.f32 %v1433_v46, %v1427_v47 }
0x13e9   :  { %1437 = vrot.lane.b32.xlu0 %v1435_v49, %s2248_s3 }
0x145b   :  { %v1438_v50 = vpop.permute.xlu0 %1437 }
0x145c   :  { %v1440_v51 = vadd.f32 %v1438_v50, %v1430_v44 }
0x145e   :  { %2053 = vtanh.f32 %v1440_v51 }
0x1464   :  { %v2054_v57 = vpop.eup %2053 }
0x1465   :  { %1443 = vrot.lane.b32.xlu1 %v2054_v57, %s2241_s25 }
0x14d7   :  { %v1444_v9 = vpop.permute.xlu1 %1443 }
0x14d8   :  { %v1446_v54 = vmul.f32 %v1444_v9, %v1427_v47 }
0x14da   :  { %v1447_v48 = vpack.c.bf16 %v1446_v54, %v1446_v54 }
0x14dc   :  { %1449 = vrot.lane.b32.xlu2 %v1447_v48, %s2248_s3 }
0x1536   :  { %v1450_v59 = vpop.permute.xlu2 %1449 }
0x1537   :  { %1844 = vmatmul.msk.bf16.vlgmr.msrb.gmra.mxu1 %vm167_vm10, %v1450_v59 }
0x15b4   :  { %v1463_v63 = vpop.f32.mrf.mxu1 }
0x15b5   :  { %v1467_v15 = vadd.f32 %v1463_v63, %v1155_v11 }
0x15b7   :  { %2055 = vtanh.f32 %v1467_v15  ;;  %v1845_v12 = vmul.f32 -1.442695, %v1467_v15 }
0x15b9   :  { %2057 = vpow2.f32 %v1845_v12 }
0x15bc   :  { %v1465_v53 = vpop.f32.mrf.mxu1 }
0x15bd   :  { %v2056_v0 = vpop.eup %2055 }
0x15be   :  { %1490 = vrot.lane.b32.xlu0 %v2056_v0, %s2241_s25 }
0x15bf   :  { %v2058_v1 = vpop.eup %2057 }
0x15c0   :  { %v1471_v62 = vadd.f32 1.0, %v2058_v1 }
0x15c2   :  { %2059 = vrcp.f32 %v1471_v62  ;;  %v1483_v13 = vand.u32 2147483648, %v1471_v62  ;;  %vm1477_vm13 = vweird.f32 %v1471_v62  ;;  %v1481_v4 = vand.u32 2147483647, %v1471_v62 }
0x15c4   :  { %v1484_v5 = vor.u32 1.1754944e-38, %v1483_v13  ;;  %vm1482_vm15 = vcmp.eq.f32.partialorder %v1481_v4, 8.507059e+37 }
0x15c8   :  { %v2060_v58 = vpop.eup %2059 }
0x15c9   :  { %v1473_v7 = vmul.f32 %v2060_v58, %v1471_v62  ;;  %vm1478_vm12 = vweird.f32 %v2060_v58 }
0x15ca   :  { %vm1479_vm14 = vmor %vm1477_vm13, %vm1478_vm12  ;;  %vm1756_vm13 = vcmask 58368  }
0x15cb   :  { %v1474_v56 = vsub.f32 1.0, %v1473_v7 }
0x15cd   :  { %v1475_v32 = vmul.f32 %v2060_v58, %v1474_v56 }
0x15cf   :  { %v1476_v8 = vadd.f32 %v2060_v58, %v1475_v32 }
0x15d1   :  { %v1480_v14 = vsel %vm1479_vm14, %v2060_v58, %v1476_v8 }
0x15d2   :  { %v1485_v6 = vsel %vm1482_vm15, %v1484_v5, %v1480_v14 }
0x15d3   :  { %v1488_v18 = vmul.f32 %v1485_v6, %v1440_v51  ;;  %v2087_v51 = vld [vmem:[%s2669_s6] ss:$0 sm:$0xff] }
0x15d4   :  { %v1181_v57 = vadd.f32 %v2087_v51, %v2580_v10 }
0x1630   :  { %v1491_v25 = vpop.permute.xlu0 %1490 }
0x1631   :  { %v1493_v16 = vmul.f32 %v1491_v25, %v1485_v6 }
0x1633   :  { %1495 = vrot.lane.b32.xlu1 %v1493_v16, %s2248_s3 }
0x16a5   :  { %v1496_v17 = vpop.permute.xlu1 %1495 }
0x16a6   :  { %v1498_v52 = vadd.f32 %v1496_v17, %v1488_v18 }
0x16a8   :  { %2061 = vtanh.f32 %v1498_v52 }
0x16ae   :  { %v2062_v19 = vpop.eup %2061 }
0x16af   :  { %1501 = vrot.lane.b32.xlu2 %v2062_v19, %s2241_s25 }
0x1709   :  { %v1502_v23 = vpop.permute.xlu2 %1501 }
0x170a   :  { %v1504_v24 = vmul.f32 %v1502_v23, %v1485_v6 }
0x170c   :  { %v1505_v26 = vpack.c.bf16 %v1504_v24, %v1504_v24 }
0x170e   :  { %1507 = vrot.lane.b32.xlu0 %v1505_v26, %s2248_s3 }
0x1780   :  { %v1508_v27 = vpop.permute.xlu0 %1507 }
0x1781   :  { %1846 = vmatmul.msk.bf16.vlgmr.msrb.gmra.mxu2 %vm167_vm10, %v1508_v27 }
0x1804   :  { %v1521_v29 = vpop.f32.mrf.mxu2 }
0x1805   :  { %v1525_v30 = vadd.f32 %v1521_v29, %v1168_v28 }
0x1807   :  { %2063 = vtanh.f32 %v1525_v30  ;;  %v1847_v36 = vmul.f32 -1.442695, %v1525_v30 }
0x1809   :  { %2065 = vpow2.f32 %v1847_v36 }
0x180c   :  { %v1523_v31 = vpop.f32.mrf.mxu2 }
0x180d   :  { %v2064_v33 = vpop.eup %2063 }
0x180e   :  { %1548 = vrot.lane.b32.xlu1 %v2064_v33, %s2241_s25 }
0x180f   :  { %v2066_v35 = vpop.eup %2065 }
0x1810   :  { %v1529_v34 = vadd.f32 1.0, %v2066_v35 }
0x1812   :  { %2067 = vrcp.f32 %v1529_v34  ;;  %v1541_v40 = vand.u32 2147483648, %v1529_v34  ;;  %vm1535_vm1 = vweird.f32 %v1529_v34  ;;  %v1539_v2 = vand.u32 2147483647, %v1529_v34 }
0x1814   :  { %v1542_v41 = vor.u32 1.1754944e-38, %v1541_v40  ;;  %vm1540_vm3 = vcmp.eq.f32.partialorder %v1539_v2, 8.507059e+37 }
0x1818   :  { %v2068_v37 = vpop.eup %2067 }
0x1819   :  { %v1531_v38 = vmul.f32 %v2068_v37, %v1529_v34  ;;  %vm1536_vm0 = vweird.f32 %v2068_v37 }
0x181a   :  { %vm1537_vm2 = vmor %vm1535_vm1, %vm1536_vm0 }
0x181b   :  { %v1532_v20 = vsub.f32 1.0, %v1531_v38 }
0x181d   :  { %v1533_v21 = vmul.f32 %v2068_v37, %v1532_v20 }
0x181f   :  { %v1534_v39 = vadd.f32 %v2068_v37, %v1533_v21 }
0x1821   :  { %v1538_v3 = vsel %vm1537_vm2, %v2068_v37, %v1534_v39 }
0x1822   :  { %v1543_v43 = vsel %vm1540_vm3, %v1542_v41, %v1538_v3 }
0x1823   :  { %v1546_v61 = vmul.f32 %v1543_v43, %v1498_v52  ;;  %v1207_v52 = vadd.f32 %v2087_v51, %v2608_v22 }
0x1880   :  { %v1549_v42 = vpop.permute.xlu1 %1548 }
0x1881   :  { %v1551_v55 = vmul.f32 %v1549_v42, %v1543_v43  ;;  %v1878_v42 = vld [vmem:[#allocation10 + $0x8] sm:$0xff] }
0x1882   :  { %1712 = vmatpush.bf16.msra.mxu1 %v1878_v42 }
0x1883   :  { %1553 = vrot.lane.b32.xlu2 %v1551_v55, %s2248_s3 }
0x18dd   :  { %v1554_v45 = vpop.permute.xlu2 %1553 }
0x18de   :  { %v1556_v60 = vadd.f32 %v1554_v45, %v1546_v61 }
0x18e0   :  { %2069 = vtanh.f32 %v1556_v60 }
0x18e6   :  { %v2070_v46 = vpop.eup %2069 }
0x18e7   :  { %1559 = vrot.lane.b32.xlu0 %v2070_v46, %s2241_s25  ;;  %v1879_v46 = vld [vmem:[%s2672_s9] sm:$0xff] }
0x1959   :  { %v1560_v47 = vpop.permute.xlu0 %1559 }
0x195a   :  { %v1562_v49 = vmul.f32 %v1560_v47, %v1543_v43  ;;  %v1877_v43 = vld [vmem:[#allocation10] sm:$0xff] }
0x195b   :  { %1713 = vmatpush.bf16.msra.mxu1 %v1877_v43 }
0x195c   :  { %v1563_v44 = vpack.c.bf16 %v1562_v49, %v1562_v49  ;;  %v1893_v49 = vld [vmem:[%s2671_s8] ss:$0 sm:$0xff] }
0x195e   :  { %1565 = vrot.lane.b32.xlu1 %v1563_v44, %s2248_s3 }
0x19d0   :  { %v1566_v50 = vpop.permute.xlu1 %1565 }
0x19d1   :  { %1848 = vmatmul.msk.bf16.vlgmr.msrb.gmra.mxu3 %vm167_vm10, %v1566_v50 }
0x1a54   :  { %v1579_v9 = vpop.f32.mrf.mxu3 }
0x1a55   :  { %v1583_v54 = vadd.f32 %v1579_v9, %v1181_v57  ;;  %v1894_v9 = vld [vmem:[%s2673_s10] ss:$0 sm:$0xff] }
0x1a57   :  { %2071 = vtanh.f32 %v1583_v54  ;;  %v1849_v11 = vmul.f32 -1.442695, %v1583_v54 }
0x1a59   :  { %2073 = vpow2.f32 %v1849_v11 }
0x1a5c   :  { %v1581_v48 = vpop.f32.mrf.mxu3 }
0x1a5d   :  { %v2072_v59 = vpop.eup %2071 }
0x1a5e   :  { %1606 = vrot.lane.b32.xlu2 %v2072_v59, %s2241_s25 }
0x1a5f   :  { %v2074_v63 = vpop.eup %2073 }
0x1a60   :  { %v1587_v15 = vadd.f32 1.0, %v2074_v63 }
0x1a62   :  { %2075 = vrcp.f32 %v1587_v15  ;;  %v1599_v58 = vand.u32 2147483648, %v1587_v15  ;;  %vm1593_vm5 = vweird.f32 %v1587_v15  ;;  %v1597_v10 = vand.u32 2147483647, %v1587_v15 }
0x1a64   :  { %v1600_v56 = vor.u32 1.1754944e-38, %v1599_v58  ;;  %vm1598_vm9 = vcmp.eq.f32.partialorder %v1597_v10, 8.507059e+37 }
0x1a68   :  { %v2076_v53 = vpop.eup %2075 }
0x1a69   :  { %v1589_v0 = vmul.f32 %v2076_v53, %v1587_v15  ;;  %vm1594_vm4 = vweird.f32 %v2076_v53 }
0x1a6a   :  { %vm1595_vm6 = vmor %vm1593_vm5, %vm1594_vm4 }
0x1a6b   :  { %v1590_v12 = vsub.f32 1.0, %v1589_v0 }
0x1a6d   :  { %v1591_v1 = vmul.f32 %v2076_v53, %v1590_v12 }
0x1a6f   :  { %v1592_v62 = vadd.f32 %v2076_v53, %v1591_v1 }
0x1a71   :  { %v1596_v7 = vsel %vm1595_vm6, %v2076_v53, %v1592_v62 }
0x1a72   :  { %v1601_v8 = vsel %vm1598_vm9, %v1600_v56, %v1596_v7 }
0x1a73   :  { %v1604_v4 = vmul.f32 %v1601_v8, %v1556_v60  ;;  %v1880_v60 = vld [vmem:[%s2672_s9 + $0x8] sm:$0xff]  ;;  %s1763_s9 = sshll.u32 %s2249_s15, 4  ;;  %s1764_s9 = int_to_ptr.vmem [resolvable:$true] %s1763_s9 }
0x1a74   :  { %1749 = vmatpush.bf16.msra.mxu2 %v1880_v60 }
0x1a78   :  { %1750 = vmatpush.bf16.msra.mxu2 %v1879_v46 }
0x1ab8   :  { %v1607_v32 = vpop.permute.xlu2 %1606 }
0x1ab9   :  { %v1609_v13 = vmul.f32 %v1607_v32, %v1601_v8 }
0x1abb   :  { %1611 = vrot.lane.b32.xlu0 %v1609_v13, %s2248_s3 }
0x1b2d   :  { %v1612_v14 = vpop.permute.xlu0 %1611 }
0x1b2e   :  { %v1614_v5 = vadd.f32 %v1612_v14, %v1604_v4 }
0x1b30   :  { %2077 = vtanh.f32 %v1614_v5 }
0x1b36   :  { %v2078_v25 = vpop.eup %2077 }
0x1b37   :  { %1617 = vrot.lane.b32.xlu1 %v2078_v25, %s2241_s25 }
0x1ba9   :  { %v1618_v6 = vpop.permute.xlu1 %1617 }
0x1baa   :  { %v1620_v16 = vmul.f32 %v1618_v6, %v1601_v8 }
0x1bac   :  { %v1621_v18 = vpack.c.bf16 %v1620_v16, %v1620_v16 }
0x1bae   :  { %1623 = vrot.lane.b32.xlu2 %v1621_v18, %s2248_s3 }
0x1c08   :  { %v1624_v17 = vpop.permute.xlu2 %1623 }
0x1c09   :  { %1850 = vmatmul.msk.bf16.vlgmr.msra.gmra.mxu0 %vm167_vm10, %v1624_v17 }
0x1c86   :  { %v1637_v19 = vpop.f32.mrf.mxu0 }
0x1c87   :  { %v1641_v23 = vadd.f32 %v1637_v19, %v1207_v52 }
0x1c89   :  { %2079 = vtanh.f32 %v1641_v23  ;;  %v1851_v27 = vmul.f32 -1.442695, %v1641_v23 }
0x1c8b   :  { %2081 = vpow2.f32 %v1851_v27 }
0x1c8e   :  { %v1639_v24 = vpop.f32.mrf.mxu0 }
0x1c8f   :  { %v2080_v26 = vpop.eup %2079 }
0x1c90   :  { %1664 = vrot.lane.b32.xlu0 %v2080_v26, %s2241_s25 }
0x1c91   :  { %v2082_v28 = vpop.eup %2081 }
0x1c92   :  { %v1645_v29 = vadd.f32 1.0, %v2082_v28 }
0x1c94   :  { %2083 = vrcp.f32 %v1645_v29  ;;  %v1657_v34 = vand.u32 2147483648, %v1645_v29  ;;  %vm1651_vm8 = vweird.f32 %v1645_v29  ;;  %v1655_v22 = vand.u32 2147483647, %v1645_v29 }
0x1c96   :  { %v1658_v38 = vor.u32 1.1754944e-38, %v1657_v34  ;;  %vm1656_vm12 = vcmp.eq.f32.partialorder %v1655_v22, 8.507059e+37 }
0x1c9a   :  { %v2084_v30 = vpop.eup %2083 }
0x1c9b   :  { %v1647_v31 = vmul.f32 %v2084_v30, %v1645_v29  ;;  %vm1652_vm7 = vweird.f32 %v2084_v30 }
0x1c9c   :  { %vm1653_vm11 = vmor %vm1651_vm8, %vm1652_vm7 }
0x1c9d   :  { %v1648_v33 = vsub.f32 1.0, %v1647_v31 }
0x1c9f   :  { %v1649_v36 = vmul.f32 %v2084_v30, %v1648_v33 }
0x1ca1   :  { %v1650_v35 = vadd.f32 %v2084_v30, %v1649_v36 }
0x1ca3   :  { %v1654_v37 = vsel %vm1653_vm11, %v2084_v30, %v1650_v35 }
0x1ca4   :  { %v1659_v21 = vsel %vm1656_vm12, %v1658_v38, %v1654_v37 }
0x1ca5   :  { %v1662_v40 = vmul.f32 %v1659_v21, %v1614_v5 }
0x1d02   :  { %v1665_v20 = vpop.permute.xlu0 %1664 }
0x1d03   :  { %v1667_v39 = vmul.f32 %v1665_v20, %v1659_v21 }
0x1d05   :  { %1669 = vrot.lane.b32.xlu1 %v1667_v39, %s2248_s3 }
0x1d77   :  { %v1670_v2 = vpop.permute.xlu1 %1669 }
0x1d78   :  { %v1672_v3 = vadd.f32 %v1670_v2, %v1662_v40 }
0x1d7a   :  { %2085 = vtanh.f32 %v1672_v3 }
0x1d80   :  { %v2086_v41 = vpop.eup %2085 }
0x1d81   :  { %1675 = vrot.lane.b32.xlu2 %v2086_v41, %s2241_s25 }
0x1ddb   :  { %v1676_v55 = vpop.permute.xlu2 %1675 }
0x1ddc   :  { %v1678_v61 = vmul.f32 %v1676_v55, %v1659_v21 }
0x1dde   :  { %v1679_v45 = vpack.c.bf16 %v1678_v61, %v1678_v61 }
0x1de0   :  { %1689 = vrot.lane.b32.xlu0 %v1679_v45, %s2248_s3 }
0x1e52   :  { %v1690_v47 = vpop.permute.xlu0 %1689 }
0x1e53   :  { %1860 = vmatmul.msk.bf16.vlgmr.msra.gmra.mxu1 %vm167_vm10, %v1690_v47 }
0x1ed0   :  { %v1715_v44 = vpop.f32.mrf.mxu1 }
0x1ed1   :  { %v1716_v50 = vadd.f32 %v1893_v49, %v1715_v44 }
0x1ed3   :  { %v1719_v51 = vpack.c.bf16 %v1716_v50, %v1716_v50 }
0x1ed5   :  { %1869 = vmatmul.msk.bf16.vlgmr.msra.gmra.mxu2 %vm167_vm10, %v1719_v51 }
0x1ed8   :  { %v1717_v57 = vpop.f32.mrf.mxu1 }
0x1f58   :  { %v1752_v54 = vpop.f32.mrf.mxu2 }
0x1f59   :  { %v1753_v48 = vadd.f32 %v1894_v9, %v1752_v54 }
0x1f5b   :  { %1757 = vst.msk [vmem:[#allocation11] sm:$0x3] %vm1756_vm13, %v1753_v48 }
0x1f5c   :  { %1768 = dma.vmem_to_hbm [thread:$0]  %s1764_s9, 32, %s1766_s18, [#allocation4]  }
0x1f60   :  { %v1754_v59 = vpop.f32.mrf.mxu2 }
0x1f61   :  { %2238 = dma.done.wait [#allocation4], 32  }
0x1f62   :  { %2239 = vsyncadd [#allocation4], 4294967264 }
0x1f63   :  { %1773 = vsyncpa [#allocation3], 1 }
0x1f64   :  { %1774 = vsyncpa [#allocation6], 1 }
0x1f65   :  { %1775 = vsyncpa [#allocation9], 1 }
0x1f66   :  { %1776 = vsyncpa [#allocation4], 1 }

</bundles_post_ra>
